<compile_context>
chip_gen: v7x
topology: tpu7x:2x2x1
jax: 0.10.0
libtpu: 0.0.40
codegen_flags: <defaults>
</compile_context>

<pallas_src>
import functools
import math

import jax
import jax.numpy as jnp
import numpy as np
from jax.experimental import pallas as pl
from jax.experimental.pallas import tpu as pltpu

# ---- small synthetic config (mirrors the M2DPRConfig fields that matter) ----
BATCH = 2
NUM_TASKS = 4            # pretrain_cross_attention_tasks_num (all 4 tasks on)
SEQ = 8
HIDDEN = 32
NUM_HEADS = 4
HEAD_DIM = HIDDEN // NUM_HEADS
INTERMEDIATE = 64
NUM_LAYERS = 2           # cross_attention_num_hidden_layers (small for the demo)
LN_EPS = 1e-12
BATCH_TILE = BATCH       # batch elements fused per grid step (demo: all of them)
NEG_INF = -1e9           # additive mask for invalid (cross-item / task-key) columns


# ------------------------- math helpers (traced in-kernel) -------------------
def _softmax_last(x):
    m = jnp.max(x, axis=-1, keepdims=True)
    e = jnp.exp(x - m)
    # Reciprocal on the EUP slot (approx error ~1e-6 rel, far below tolerance).
    return e * pl.reciprocal(jnp.sum(e, axis=-1, keepdims=True), approx=True)


def _layer_norm(x, gamma, beta, eps):
    mu = jnp.mean(x, axis=-1, keepdims=True)
    var = jnp.mean(jnp.square(x - mu), axis=-1, keepdims=True)
    return (x - mu) * jax.lax.rsqrt(var + eps) * gamma + beta


# TODO(synk): HF hidden_act='gelu' is the exact erf-based GELU; using the tanh
# approximation here for robust Mosaic lowering (max abs difference ~3e-4).
def _gelu(x):
    c = math.sqrt(2.0 / math.pi)
    return 0.5 * x * (1.0 + jnp.tanh(c * (x + 0.044715 * x * x * x)))


# ------------------------------- Pallas kernel -------------------------------
def _m2dpr_block_kernel(x_ref, mask_ref, qsel_ref,
                        wqkv, bqkv, wao, bao, g1, b1,
                        wi, bi, wo, bo, g2, b2,
                        out_ref,
                        st,
                        *, num_heads, head_dim, eps):
    """One grid step = one batch tile x one layer; all task+text rows of all
    batch items in the tile are processed as a single fused (R, H) row block."""
    hsz = num_heads * head_dim
    layer = pl.program_id(1)

    # Seed the resident fused residual stream at layer 0 (one full-block store).
    @pl.when(layer == 0)
    def _():
        st[...] = x_ref[0]

    x = st[...]                              # (R, H) f32 residual, carried across layers
    xb = x.astype(jnp.bfloat16)              # cast once, reused by the projection
    mask = mask_ref[0]                       # (R, R) additive block-diagonal mask (hoisted)
    qsel = qsel_ref[...]                     # (R, H): 1.0 on task rows, 0.0 on text rows

    # Fused Q_task | Q_text | K | V projection: one lane-dense (R,H)x(H,4H) matmul.
    qkv = jnp.dot(xb, wqkv[0], preferred_element_type=jnp.float32) + bqkv[0]
    # Row-wise query select (task rows use `query`, text rows use `text_query`);
    # exact because one side is multiplied by 0.0. No scratch round trip.
    q = qsel * qkv[:, :hsz] + (1.0 - qsel) * qkv[:, hsz:2 * hsz]
    k = qkv[:, 2 * hsz:3 * hsz]
    v = qkv[:, 3 * hsz:]

    qb = q.astype(jnp.bfloat16)
    kb = k.astype(jnp.bfloat16)
    vb = v.astype(jnp.bfloat16)

    # Multi-head block-diagonal attention. BertSelfOutput's dense is folded in
    # per head: acc += (p_h @ v_h) @ wao_h  -> no context scratch, no masked
    # 8-lane column stores. Head loop is unrolled at trace time.
    scale = 1.0 / math.sqrt(head_dim)
    acc = bao[0] + x                         # dense bias + residual (f32)
    for h in range(num_heads):
        lo = h * head_dim
        s = jax.lax.dot_general(qb[:, lo:lo + head_dim], kb[:, lo:lo + head_dim],
                                (((1,), (1,)), ((), ())),
                                preferred_element_type=jnp.float32) * scale + mask
        p = _softmax_last(s)                 # f32 softmax
        ctx = jnp.dot(p.astype(jnp.bfloat16), vb[:, lo:lo + head_dim],
                      preferred_element_type=jnp.float32)
        acc = acc + jnp.dot(ctx.astype(jnp.bfloat16), wao[0, lo:lo + head_dim, :],
                            preferred_element_type=jnp.float32)

    # BertSelfOutput LayerNorm (dropout = identity); shared across task/text rows.
    attn = _layer_norm(acc, g1[0], b1[0], eps)

    # BertIntermediate + BertOutput; shared across task/text rows.
    inter = _gelu(jnp.dot(attn.astype(jnp.bfloat16), wi[0],
                          preferred_element_type=jnp.float32) + bi[0])
    y = jnp.dot(inter.astype(jnp.bfloat16), wo[0],
                preferred_element_type=jnp.float32) + bo[0]
    out = _layer_norm(y + attn, g2[0], b2[0], eps)

    st[...] = out                            # carry the residual stream to the next layer

    @pl.when(layer == pl.num_programs(1) - 1)
    def _():
        out_ref[0] = out                     # rows [:T] per item = task, rows [T:] = text


# ------------------------------- wrapper --------------------------------------
def m2dpr_block_forward(task_reprs, hidden_states, attention_mask, layer_params,
                        batch_tile=None):
    """M2DPRBlock.forward with extra_text_query=True. Returns (hidden_states, task_reprs)."""
    B, T, H = task_reprs.shape
    S = hidden_states.shape[1]
    L = len(layer_params)
    bt = B if batch_tile is None else batch_tile
    assert B % bt == 0, "batch must be divisible by the batch tile"
    nb = B // bt
    R = bt * (T + S)

    # Fused [task ; hidden] activation block per batch tile: (nb, bt*(T+S), H).
    x0 = jnp.concatenate([task_reprs, hidden_states], axis=1).astype(jnp.float32)
    x0 = x0.reshape(nb, R, H)

    # Block-diagonal additive attention mask over the fused rows:
    #   a key column is valid iff it is a hidden (text) row of the SAME batch item;
    #   valid columns carry the original additive mask value, everything else gets
    #   NEG_INF (exp underflows to exactly 0, matching the per-item reference).
    am = attention_mask.reshape(B, S).astype(jnp.float32)
    idx = jnp.arange(R)
    q_item = idx // (T + S)
    k_item = idx // (T + S)
    k_pos = idx % (T + S)
    valid = (q_item[:, None] == k_item[None, :]) & (k_pos >= T)[None, :]   # (R, R)
    am_tiles = am.reshape(nb, bt, S)
    col_vals = am_tiles[:, k_item, jnp.clip(k_pos - T, 0, S - 1)]          # (nb, R)
    big_mask = jnp.where(valid[None], col_vals[:, None, :], jnp.float32(NEG_INF))

    # Row selector for the fused query: 1.0 on task rows, 0.0 on text rows.
    is_task_row = ((idx % (T + S)) < T).astype(jnp.float32)
    qsel = jnp.broadcast_to(is_task_row[:, None], (R, H))

    # Stack per-layer weights along a leading layer axis.
    # Matmul weights -> bf16 (f32 accumulation in-kernel); biases/LN params stay f32.
    def stack(name, dtype):
        return jnp.stack([p[name] for p in layer_params]).astype(dtype)

    wqkv = jnp.stack([jnp.concatenate([p["wq"], p["wtq"], p["wk"], p["wv"]], axis=1)
                      for p in layer_params]).astype(jnp.bfloat16)
    bqkv = jnp.stack([jnp.concatenate([p["bq"], p["btq"], p["bk"], p["bv"]], axis=1)
                      for p in layer_params]).astype(jnp.float32)
    weights = [
        wqkv, bqkv,
        stack("wao", jnp.bfloat16), stack("bao", jnp.float32),
        stack("g1", jnp.float32), stack("b1", jnp.float32),
        stack("wi", jnp.bfloat16), stack("bi", jnp.float32),
        stack("wo", jnp.bfloat16), stack("bo", jnp.float32),
        stack("g2", jnp.float32), stack("b2", jnp.float32),
    ]

    kernel = functools.partial(_m2dpr_block_kernel,
                               num_heads=NUM_HEADS, head_dim=HEAD_DIM, eps=LN_EPS)

    def w_spec(arr):
        # Per-layer weight block, double-buffered along the sequential layer axis.
        return pl.BlockSpec((1,) + arr.shape[1:], lambda b, l: (l, 0, 0))

    # grid = (batch_tile, layer): batch tiles are embarrassingly parallel (megacore),
    # the layer axis is a sequential carry held in the VMEM scratch `st`.
    out = pl.pallas_call(
        kernel,
        grid=(nb, L),
        in_specs=[pl.BlockSpec((1, R, H), lambda b, l: (b, 0, 0)),   # fused activations
                  pl.BlockSpec((1, R, R), lambda b, l: (b, 0, 0)),   # block-diag mask
                  pl.BlockSpec((R, H), lambda b, l: (0, 0))]         # query row selector
                 + [w_spec(w) for w in weights],
        out_specs=pl.BlockSpec((1, R, H), lambda b, l: (b, 0, 0)),
        out_shape=jax.ShapeDtypeStruct((nb, R, H), jnp.float32),
        scratch_shapes=[pltpu.VMEM((R, H), jnp.float32)],            # resident residual stream
        compiler_params=pltpu.CompilerParams(
            dimension_semantics=("parallel", "arbitrary")),
    )(x0, big_mask, qsel, *weights)

    out = out.reshape(B, T + S, H)
    task_out = out[:, :T, :]
    hid_out = out[:, T:, :]
    return hid_out, task_out


# ------------------------- plain-JAX reference (check) -----------------------
def _ref_mha(q, k, v, mask4):
    B, Lq, H = q.shape
    S = k.shape[1]
    d = HEAD_DIM
    qh = q.reshape(B, Lq, NUM_HEADS, d).transpose(0, 2, 1, 3)
    kh = k.reshape(B, S, NUM_HEADS, d).transpose(0, 2, 1, 3)
    vh = v.reshape(B, S, NUM_HEADS, d).transpose(0, 2, 1, 3)
    s = jnp.einsum("bhld,bhsd->bhls", qh, kh) / math.sqrt(d) + mask4
    p = jax.nn.softmax(s, axis=-1)
    c = jnp.einsum("bhls,bhsd->bhld", p, vh)
    return c.transpose(0, 2, 1, 3).reshape(B, Lq, H)


def _ref_layer(task, hid, mask4, p):
    k_proj = hid @ p["wk"] + p["bk"]
    v_proj = hid @ p["wv"] + p["bv"]
    q_task = task @ p["wq"] + p["bq"]
    q_text = hid @ p["wtq"] + p["btq"]
    ctx_t = _ref_mha(q_task, k_proj, v_proj, mask4)
    ctx_x = _ref_mha(q_text, k_proj, v_proj, mask4)

    def self_out(ctx, res):
        return _layer_norm(ctx @ p["wao"] + p["bao"] + res, p["g1"], p["b1"], LN_EPS)

    def ffn(x):
        inter = _gelu(x @ p["wi"] + p["bi"])
        return _layer_norm(inter @ p["wo"] + p["bo"] + x, p["g2"], p["b2"], LN_EPS)

    return ffn(self_out(ctx_t, task)), ffn(self_out(ctx_x, hid))


def _ref_block(task, hid, mask, layer_params):
    mask4 = mask.astype(jnp.float32)           # (B,1,1,S)
    for p in layer_params:
        task, hid = _ref_layer(task, hid, mask4, p)
    return hid, task


# --------------------------------- params ------------------------------------
def init_layer_params(key):
    std = 0.02
    ks = jax.random.split(key, 6)

    def lin(k, fin, fout):
        return jax.random.normal(k, (fin, fout), jnp.float32) * std

    H, I = HIDDEN, INTERMEDIATE
    z = lambda n: jnp.zeros((1, n), jnp.float32)
    o = lambda n: jnp.ones((1, n), jnp.float32)
    return {
        "wq": lin(ks[0], H, H),  "bq": z(H),
        "wtq": lin(ks[1], H, H), "btq": z(H),
        "wk": lin(ks[2], H, H),  "bk": z(H),
        "wv": lin(ks[3], H, H),  "bv": z(H),
        "wao": lin(ks[4], H, H), "bao": z(H),
        "g1": o(H), "b1": z(H),
        "wi": lin(ks[5], H, I),  "bi": z(I),
        "wo": lin(jax.random.fold_in(key, 99), I, H), "bo": z(H),
        "g2": o(H), "b2": z(H),
    }


if __name__ == "__main__":
    key = jax.random.PRNGKey(0)
    k_task, k_hid, k_params = jax.random.split(key, 3)

    task_reprs = jax.random.normal(k_task, (BATCH, NUM_TASKS, HIDDEN), jnp.float32)
    hidden_states = jax.random.normal(k_hid, (BATCH, SEQ, HIDDEN), jnp.float32)

    # Additive attention mask [B,1,1,S]: batch 0 fully valid, batch 1 masks last 2.
    valid_len = np.array([SEQ, SEQ - 2])
    pos = np.arange(SEQ)[None, :]
    mask_np = np.where(pos < valid_len[:, None], 0.0, -10000.0).astype(np.float32)
    attention_mask = jnp.asarray(mask_np).reshape(BATCH, 1, 1, SEQ)

    layer_params = [init_layer_params(jax.random.fold_in(k_params, i))
                    for i in range(NUM_LAYERS)]

    hid_out, task_out = m2dpr_block_forward(
        task_reprs, hidden_states, attention_mask, layer_params,
        batch_tile=BATCH_TILE)
    hid_out = jax.block_until_ready(hid_out)
    task_out = jax.block_until_ready(task_out)

    hid_ref, task_ref = _ref_block(task_reprs, hidden_states, attention_mask,
                                   layer_params)
    # Kernel uses bf16 matmul operands (f32 accumulation) vs the pure-f32 reference,
    # so tolerance is relaxed to 1e-2 (observed error ~1e-3).
    np.testing.assert_allclose(np.asarray(hid_out), np.asarray(hid_ref),
                               rtol=1e-2, atol=1e-2)
    np.testing.assert_allclose(np.asarray(task_out), np.asarray(task_ref),
                               rtol=1e-2, atol=1e-2)

    print("KERNEL_OK")
</pallas_src>

<mosaic_0001>
module attributes {stable_mosaic.version = 11 : i64} {
  func.func @_m2dpr_block_kernel(%arg0: i32, %arg1: i32, %arg2: memref<1x24x32xf32, #tpu.memory_space<vmem>>, %arg3: memref<1x24x24xf32, #tpu.memory_space<vmem>>, %arg4: memref<24x32xf32, #tpu.memory_space<vmem>>, %arg5: memref<1x32x128xbf16, #tpu.memory_space<vmem>>, %arg6: memref<1x1x128xf32, #tpu.memory_space<vmem>>, %arg7: memref<1x32x32xbf16, #tpu.memory_space<vmem>>, %arg8: memref<1x1x32xf32, #tpu.memory_space<vmem>>, %arg9: memref<1x1x32xf32, #tpu.memory_space<vmem>>, %arg10: memref<1x1x32xf32, #tpu.memory_space<vmem>>, %arg11: memref<1x32x64xbf16, #tpu.memory_space<vmem>>, %arg12: memref<1x1x64xf32, #tpu.memory_space<vmem>>, %arg13: memref<1x64x32xbf16, #tpu.memory_space<vmem>>, %arg14: memref<1x1x32xf32, #tpu.memory_space<vmem>>, %arg15: memref<1x1x32xf32, #tpu.memory_space<vmem>>, %arg16: memref<1x1x32xf32, #tpu.memory_space<vmem>>, %arg17: memref<1x24x32xf32, #tpu.memory_space<vmem>>, %arg18: memref<24x32xf32, #tpu.memory_space<vmem>>) attributes {dimension_semantics = [#tpu.dimension_semantics<parallel>, #tpu.dimension_semantics<arbitrary>], iteration_bounds = array<i64: 1, 2>, scalar_prefetch = 0 : i64, scratch_operands = 1 : i64, tpu.core_type = #tpu.core_type<tc>, window_params = [{transform_indices = @transform_0, window_bounds = array<i64: 1, 24, 32>}, {transform_indices = @transform_1, window_bounds = array<i64: 1, 24, 24>}, {pipeline_mode = #tpu.pipeline_mode<synchronous>, transform_indices = @transform_2, window_bounds = array<i64: 24, 32>}, {transform_indices = @transform_3, window_bounds = array<i64: 1, 32, 128>}, {transform_indices = @transform_4, window_bounds = array<i64: 1, 1, 128>}, {transform_indices = @transform_5, window_bounds = array<i64: 1, 32, 32>}, {transform_indices = @transform_6, window_bounds = array<i64: 1, 1, 32>}, {transform_indices = @transform_7, window_bounds = array<i64: 1, 1, 32>}, {transform_indices = @transform_8, window_bounds = array<i64: 1, 1, 32>}, {transform_indices = @transform_9, window_bounds = array<i64: 1, 32, 64>}, {transform_indices = @transform_10, window_bounds = array<i64: 1, 1, 64>}, {transform_indices = @transform_11, window_bounds = array<i64: 1, 64, 32>}, {transform_indices = @transform_12, window_bounds = array<i64: 1, 1, 32>}, {transform_indices = @transform_13, window_bounds = array<i64: 1, 1, 32>}, {transform_indices = @transform_14, window_bounds = array<i64: 1, 1, 32>}, {transform_indices = @transform_15, window_bounds = array<i64: 1, 24, 32>}]} {
    %c0_i32 = arith.constant 0 : i32
    %0 = arith.cmpi eq, %arg1, %c0_i32 : i32
    %1 = arith.extui %0 : i1 to i32
    %c0_i32_0 = arith.constant 0 : i32
    %2 = arith.cmpi ne, %1, %c0_i32_0 : i32
    scf.if %2 {
      %c0_93 = arith.constant 0 : index
      %c0_94 = arith.constant 0 : index
      %c0_95 = arith.constant 0 : index
      %213 = vector.load %arg2[%c0_93, %c0_94, %c0_95] : memref<1x24x32xf32, #tpu.memory_space<vmem>>, vector<1x24x32xf32>
      %214 = vector.shape_cast %213 : vector<1x24x32xf32> to vector<24x32xf32>
      %c0_96 = arith.constant 0 : index
      %c0_97 = arith.constant 0 : index
      %215 = vector.load %arg18[%c0_96, %c0_97] : memref<24x32xf32, #tpu.memory_space<vmem>>, vector<24x32xf32>
      tpu.vector_store %arg18[%c0_96, %c0_97], %214 {strides = array<i32>} : memref<24x32xf32, #tpu.memory_space<vmem>>, vector<24x32xf32>,
    } else {
    }
    %c0 = arith.constant 0 : index
    %c0_1 = arith.constant 0 : index
    %3 = vector.load %arg18[%c0, %c0_1] : memref<24x32xf32, #tpu.memory_space<vmem>>, vector<24x32xf32>
    %4 = arith.truncf %3 : vector<24x32xf32> to vector<24x32xbf16>
    %c0_2 = arith.constant 0 : index
    %c0_3 = arith.constant 0 : index
    %c0_4 = arith.constant 0 : index
    %5 = vector.load %arg3[%c0_2, %c0_3, %c0_4] : memref<1x24x24xf32, #tpu.memory_space<vmem>>, vector<1x24x24xf32>
    %6 = vector.shape_cast %5 : vector<1x24x24xf32> to vector<24x24xf32>
    %c0_5 = arith.constant 0 : index
    %c0_6 = arith.constant 0 : index
    %7 = vector.load %arg4[%c0_5, %c0_6] : memref<24x32xf32, #tpu.memory_space<vmem>>, vector<24x32xf32>
    %c0_7 = arith.constant 0 : index
    %c0_8 = arith.constant 0 : index
    %c0_9 = arith.constant 0 : index
    %8 = vector.load %arg5[%c0_7, %c0_8, %c0_9] : memref<1x32x128xbf16, #tpu.memory_space<vmem>>, vector<1x32x128xbf16>
    %9 = vector.shape_cast %8 : vector<1x32x128xbf16> to vector<32x128xbf16>
    %cst = arith.constant dense<0.000000e+00> : vector<24x128xf32>
    %10 = tpu.matmul %4, %9, %cst {dimension_numbers = #tpu.dot_dimension_numbers<[1], [0], [0], [1], [0, 0, 1, 1], [], []>} : vector<24x32xbf16>, vector<32x128xbf16>, vector<24x128xf32> -> vector<24x128xf32>
    %c0_10 = arith.constant 0 : index
    %c0_11 = arith.constant 0 : index
    %c0_12 = arith.constant 0 : index
    %11 = vector.load %arg6[%c0_10, %c0_11, %c0_12] : memref<1x1x128xf32, #tpu.memory_space<vmem>>, vector<1x1x128xf32>
    %12 = vector.shape_cast %11 : vector<1x1x128xf32> to vector<1x128xf32>
    %13 = vector.broadcast %12 : vector<1x128xf32> to vector<24x128xf32>
    %14 = arith.addf %10, %13 : vector<24x128xf32>
    %15 = vector.extract_strided_slice %14 {offsets = [0, 0], sizes = [24, 32], strides = [1, 1]} : vector<24x128xf32> to vector<24x32xf32>
    %16 = arith.mulf %7, %15 : vector<24x32xf32>
    %cst_13 = arith.constant 1.000000e+00 : f32
    %17 = vector.broadcast %cst_13 : f32 to vector<24x32xf32>
    %18 = arith.subf %17, %7 : vector<24x32xf32>
    %19 = vector.extract_strided_slice %14 {offsets = [0, 32], sizes = [24, 32], strides = [1, 1]} : vector<24x128xf32> to vector<24x32xf32>
    %20 = arith.mulf %18, %19 : vector<24x32xf32>
    %21 = arith.addf %16, %20 : vector<24x32xf32>
    %22 = vector.extract_strided_slice %14 {offsets = [0, 64], sizes = [24, 32], strides = [1, 1]} : vector<24x128xf32> to vector<24x32xf32>
    %23 = vector.extract_strided_slice %14 {offsets = [0, 96], sizes = [24, 32], strides = [1, 1]} : vector<24x128xf32> to vector<24x32xf32>
    %24 = arith.truncf %21 : vector<24x32xf32> to vector<24x32xbf16>
    %25 = arith.truncf %22 : vector<24x32xf32> to vector<24x32xbf16>
    %26 = arith.truncf %23 : vector<24x32xf32> to vector<24x32xbf16>
    %c0_14 = arith.constant 0 : index
    %c0_15 = arith.constant 0 : index
    %c0_16 = arith.constant 0 : index
    %27 = vector.load %arg8[%c0_14, %c0_15, %c0_16] : memref<1x1x32xf32, #tpu.memory_space<vmem>>, vector<1x1x32xf32>
    %28 = vector.shape_cast %27 : vector<1x1x32xf32> to vector<1x32xf32>
    %29 = vector.broadcast %28 : vector<1x32xf32> to vector<24x32xf32>
    %30 = arith.addf %29, %3 : vector<24x32xf32>
    %31 = vector.extract_strided_slice %24 {offsets = [0, 0], sizes = [24, 8], strides = [1, 1]} : vector<24x32xbf16> to vector<24x8xbf16>
    %32 = vector.extract_strided_slice %25 {offsets = [0, 0], sizes = [24, 8], strides = [1, 1]} : vector<24x32xbf16> to vector<24x8xbf16>
    %cst_17 = arith.constant dense<0.000000e+00> : vector<24x24xf32>
    %33 = tpu.matmul %31, %32, %cst_17 {dimension_numbers = #tpu.dot_dimension_numbers<[1], [1], [0], [0], [0, 0, 1, 0], [], []>} : vector<24x8xbf16>, vector<24x8xbf16>, vector<24x24xf32> -> vector<24x24xf32>
    %cst_18 = arith.constant 0.353553385 : f32
    %34 = vector.broadcast %cst_18 : f32 to vector<24x24xf32>
    %35 = arith.mulf %33, %34 : vector<24x24xf32>
    %36 = arith.addf %35, %6 : vector<24x24xf32>
    %cst_19 = arith.constant dense<0xFF800000> : vector<24xf32>
    %37 = vector.multi_reduction <maximumf>, %36, %cst_19 [1] : vector<24x24xf32> to vector<24xf32>
    %38 = vector.shape_cast %37 : vector<24xf32> to vector<24x1xf32>
    %39 = vector.broadcast %38 : vector<24x1xf32> to vector<24x24xf32>
    %40 = arith.subf %36, %39 : vector<24x24xf32>
    %41 = math.exp %40 : vector<24x24xf32>
    %cst_20 = arith.constant dense<0.000000e+00> : vector<24xf32>
    %42 = vector.multi_reduction <add>, %41, %cst_20 [1] : vector<24x24xf32> to vector<24xf32>
    %43 = vector.shape_cast %42 : vector<24xf32> to vector<24x1xf32>
    %44 = tpu.reciprocal %43 {approx = true} : vector<24x1xf32> -> vector<24x1xf32>
    %45 = vector.broadcast %44 : vector<24x1xf32> to vector<24x24xf32>
    %46 = arith.mulf %41, %45 : vector<24x24xf32>
    %47 = arith.truncf %46 : vector<24x24xf32> to vector<24x24xbf16>
    %48 = vector.extract_strided_slice %26 {offsets = [0, 0], sizes = [24, 8], strides = [1, 1]} : vector<24x32xbf16> to vector<24x8xbf16>
    %cst_21 = arith.constant dense<0.000000e+00> : vector<24x8xf32>
    %49 = tpu.matmul %47, %48, %cst_21 {dimension_numbers = #tpu.dot_dimension_numbers<[1], [0], [0], [1], [0, 0, 1, 1], [], []>} : vector<24x24xbf16>, vector<24x8xbf16>, vector<24x8xf32> -> vector<24x8xf32>
    %50 = arith.truncf %49 : vector<24x8xf32> to vector<24x8xbf16>
    %c0_22 = arith.constant 0 : index
    %c0_23 = arith.constant 0 : index
    %c0_24 = arith.constant 0 : index
    %51 = vector.load %arg7[%c0_22, %c0_23, %c0_24] : memref<1x32x32xbf16, #tpu.memory_space<vmem>>, vector<1x8x32xbf16>
    %52 = vector.shape_cast %51 : vector<1x8x32xbf16> to vector<8x32xbf16>
    %cst_25 = arith.constant dense<0.000000e+00> : vector<24x32xf32>
    %53 = tpu.matmul %50, %52, %cst_25 {dimension_numbers = #tpu.dot_dimension_numbers<[1], [0], [0], [1], [0, 0, 1, 1], [], []>} : vector<24x8xbf16>, vector<8x32xbf16>, vector<24x32xf32> -> vector<24x32xf32>
    %54 = arith.addf %30, %53 : vector<24x32xf32>
    %55 = vector.extract_strided_slice %24 {offsets = [0, 8], sizes = [24, 8], strides = [1, 1]} : vector<24x32xbf16> to vector<24x8xbf16>
    %56 = vector.extract_strided_slice %25 {offsets = [0, 8], sizes = [24, 8], strides = [1, 1]} : vector<24x32xbf16> to vector<24x8xbf16>
    %cst_26 = arith.constant dense<0.000000e+00> : vector<24x24xf32>
    %57 = tpu.matmul %55, %56, %cst_26 {dimension_numbers = #tpu.dot_dimension_numbers<[1], [1], [0], [0], [0, 0, 1, 0], [], []>} : vector<24x8xbf16>, vector<24x8xbf16>, vector<24x24xf32> -> vector<24x24xf32>
    %cst_27 = arith.constant 0.353553385 : f32
    %58 = vector.broadcast %cst_27 : f32 to vector<24x24xf32>
    %59 = arith.mulf %57, %58 : vector<24x24xf32>
    %60 = arith.addf %59, %6 : vector<24x24xf32>
    %cst_28 = arith.constant dense<0xFF800000> : vector<24xf32>
    %61 = vector.multi_reduction <maximumf>, %60, %cst_28 [1] : vector<24x24xf32> to vector<24xf32>
    %62 = vector.shape_cast %61 : vector<24xf32> to vector<24x1xf32>
    %63 = vector.broadcast %62 : vector<24x1xf32> to vector<24x24xf32>
    %64 = arith.subf %60, %63 : vector<24x24xf32>
    %65 = math.exp %64 : vector<24x24xf32>
    %cst_29 = arith.constant dense<0.000000e+00> : vector<24xf32>
    %66 = vector.multi_reduction <add>, %65, %cst_29 [1] : vector<24x24xf32> to vector<24xf32>
    %67 = vector.shape_cast %66 : vector<24xf32> to vector<24x1xf32>
    %68 = tpu.reciprocal %67 {approx = true} : vector<24x1xf32> -> vector<24x1xf32>
    %69 = vector.broadcast %68 : vector<24x1xf32> to vector<24x24xf32>
    %70 = arith.mulf %65, %69 : vector<24x24xf32>
    %71 = arith.truncf %70 : vector<24x24xf32> to vector<24x24xbf16>
    %72 = vector.extract_strided_slice %26 {offsets = [0, 8], sizes = [24, 8], strides = [1, 1]} : vector<24x32xbf16> to vector<24x8xbf16>
    %cst_30 = arith.constant dense<0.000000e+00> : vector<24x8xf32>
    %73 = tpu.matmul %71, %72, %cst_30 {dimension_numbers = #tpu.dot_dimension_numbers<[1], [0], [0], [1], [0, 0, 1, 1], [], []>} : vector<24x24xbf16>, vector<24x8xbf16>, vector<24x8xf32> -> vector<24x8xf32>
    %74 = arith.truncf %73 : vector<24x8xf32> to vector<24x8xbf16>
    %c0_31 = arith.constant 0 : index
    %c8 = arith.constant 8 : index
    %c0_32 = arith.constant 0 : index
    %75 = vector.load %arg7[%c0_31, %c8, %c0_32] : memref<1x32x32xbf16, #tpu.memory_space<vmem>>, vector<1x8x32xbf16>
    %76 = vector.shape_cast %75 : vector<1x8x32xbf16> to vector<8x32xbf16>
    %cst_33 = arith.constant dense<0.000000e+00> : vector<24x32xf32>
    %77 = tpu.matmul %74, %76, %cst_33 {dimension_numbers = #tpu.dot_dimension_numbers<[1], [0], [0], [1], [0, 0, 1, 1], [], []>} : vector<24x8xbf16>, vector<8x32xbf16>, vector<24x32xf32> -> vector<24x32xf32>
    %78 = arith.addf %54, %77 : vector<24x32xf32>
    %79 = vector.extract_strided_slice %24 {offsets = [0, 16], sizes = [24, 8], strides = [1, 1]} : vector<24x32xbf16> to vector<24x8xbf16>
    %80 = vector.extract_strided_slice %25 {offsets = [0, 16], sizes = [24, 8], strides = [1, 1]} : vector<24x32xbf16> to vector<24x8xbf16>
    %cst_34 = arith.constant dense<0.000000e+00> : vector<24x24xf32>
    %81 = tpu.matmul %79, %80, %cst_34 {dimension_numbers = #tpu.dot_dimension_numbers<[1], [1], [0], [0], [0, 0, 1, 0], [], []>} : vector<24x8xbf16>, vector<24x8xbf16>, vector<24x24xf32> -> vector<24x24xf32>
    %cst_35 = arith.constant 0.353553385 : f32
    %82 = vector.broadcast %cst_35 : f32 to vector<24x24xf32>
    %83 = arith.mulf %81, %82 : vector<24x24xf32>
    %84 = arith.addf %83, %6 : vector<24x24xf32>
    %cst_36 = arith.constant dense<0xFF800000> : vector<24xf32>
    %85 = vector.multi_reduction <maximumf>, %84, %cst_36 [1] : vector<24x24xf32> to vector<24xf32>
    %86 = vector.shape_cast %85 : vector<24xf32> to vector<24x1xf32>
    %87 = vector.broadcast %86 : vector<24x1xf32> to vector<24x24xf32>
    %88 = arith.subf %84, %87 : vector<24x24xf32>
    %89 = math.exp %88 : vector<24x24xf32>
    %cst_37 = arith.constant dense<0.000000e+00> : vector<24xf32>
    %90 = vector.multi_reduction <add>, %89, %cst_37 [1] : vector<24x24xf32> to vector<24xf32>
    %91 = vector.shape_cast %90 : vector<24xf32> to vector<24x1xf32>
    %92 = tpu.reciprocal %91 {approx = true} : vector<24x1xf32> -> vector<24x1xf32>
    %93 = vector.broadcast %92 : vector<24x1xf32> to vector<24x24xf32>
    %94 = arith.mulf %89, %93 : vector<24x24xf32>
    %95 = arith.truncf %94 : vector<24x24xf32> to vector<24x24xbf16>
    %96 = vector.extract_strided_slice %26 {offsets = [0, 16], sizes = [24, 8], strides = [1, 1]} : vector<24x32xbf16> to vector<24x8xbf16>
    %cst_38 = arith.constant dense<0.000000e+00> : vector<24x8xf32>
    %97 = tpu.matmul %95, %96, %cst_38 {dimension_numbers = #tpu.dot_dimension_numbers<[1], [0], [0], [1], [0, 0, 1, 1], [], []>} : vector<24x24xbf16>, vector<24x8xbf16>, vector<24x8xf32> -> vector<24x8xf32>
    %98 = arith.truncf %97 : vector<24x8xf32> to vector<24x8xbf16>
    %c0_39 = arith.constant 0 : index
    %c16 = arith.constant 16 : index
    %c0_40 = arith.constant 0 : index
    %99 = vector.load %arg7[%c0_39, %c16, %c0_40] : memref<1x32x32xbf16, #tpu.memory_space<vmem>>, vector<1x8x32xbf16>
    %100 = vector.shape_cast %99 : vector<1x8x32xbf16> to vector<8x32xbf16>
    %cst_41 = arith.constant dense<0.000000e+00> : vector<24x32xf32>
    %101 = tpu.matmul %98, %100, %cst_41 {dimension_numbers = #tpu.dot_dimension_numbers<[1], [0], [0], [1], [0, 0, 1, 1], [], []>} : vector<24x8xbf16>, vector<8x32xbf16>, vector<24x32xf32> -> vector<24x32xf32>
    %102 = arith.addf %78, %101 : vector<24x32xf32>
    %103 = vector.extract_strided_slice %24 {offsets = [0, 24], sizes = [24, 8], strides = [1, 1]} : vector<24x32xbf16> to vector<24x8xbf16>
    %104 = vector.extract_strided_slice %25 {offsets = [0, 24], sizes = [24, 8], strides = [1, 1]} : vector<24x32xbf16> to vector<24x8xbf16>
    %cst_42 = arith.constant dense<0.000000e+00> : vector<24x24xf32>
    %105 = tpu.matmul %103, %104, %cst_42 {dimension_numbers = #tpu.dot_dimension_numbers<[1], [1], [0], [0], [0, 0, 1, 0], [], []>} : vector<24x8xbf16>, vector<24x8xbf16>, vector<24x24xf32> -> vector<24x24xf32>
    %cst_43 = arith.constant 0.353553385 : f32
    %106 = vector.broadcast %cst_43 : f32 to vector<24x24xf32>
    %107 = arith.mulf %105, %106 : vector<24x24xf32>
    %108 = arith.addf %107, %6 : vector<24x24xf32>
    %cst_44 = arith.constant dense<0xFF800000> : vector<24xf32>
    %109 = vector.multi_reduction <maximumf>, %108, %cst_44 [1] : vector<24x24xf32> to vector<24xf32>
    %110 = vector.shape_cast %109 : vector<24xf32> to vector<24x1xf32>
    %111 = vector.broadcast %110 : vector<24x1xf32> to vector<24x24xf32>
    %112 = arith.subf %108, %111 : vector<24x24xf32>
    %113 = math.exp %112 : vector<24x24xf32>
    %cst_45 = arith.constant dense<0.000000e+00> : vector<24xf32>
    %114 = vector.multi_reduction <add>, %113, %cst_45 [1] : vector<24x24xf32> to vector<24xf32>
    %115 = vector.shape_cast %114 : vector<24xf32> to vector<24x1xf32>
    %116 = tpu.reciprocal %115 {approx = true} : vector<24x1xf32> -> vector<24x1xf32>
    %117 = vector.broadcast %116 : vector<24x1xf32> to vector<24x24xf32>
    %118 = arith.mulf %113, %117 : vector<24x24xf32>
    %119 = arith.truncf %118 : vector<24x24xf32> to vector<24x24xbf16>
    %120 = vector.extract_strided_slice %26 {offsets = [0, 24], sizes = [24, 8], strides = [1, 1]} : vector<24x32xbf16> to vector<24x8xbf16>
    %cst_46 = arith.constant dense<0.000000e+00> : vector<24x8xf32>
    %121 = tpu.matmul %119, %120, %cst_46 {dimension_numbers = #tpu.dot_dimension_numbers<[1], [0], [0], [1], [0, 0, 1, 1], [], []>} : vector<24x24xbf16>, vector<24x8xbf16>, vector<24x8xf32> -> vector<24x8xf32>
    %122 = arith.truncf %121 : vector<24x8xf32> to vector<24x8xbf16>
    %c0_47 = arith.constant 0 : index
    %c24 = arith.constant 24 : index
    %c0_48 = arith.constant 0 : index
    %123 = vector.load %arg7[%c0_47, %c24, %c0_48] : memref<1x32x32xbf16, #tpu.memory_space<vmem>>, vector<1x8x32xbf16>
    %124 = vector.shape_cast %123 : vector<1x8x32xbf16> to vector<8x32xbf16>
    %cst_49 = arith.constant dense<0.000000e+00> : vector<24x32xf32>
    %125 = tpu.matmul %122, %124, %cst_49 {dimension_numbers = #tpu.dot_dimension_numbers<[1], [0], [0], [1], [0, 0, 1, 1], [], []>} : vector<24x8xbf16>, vector<8x32xbf16>, vector<24x32xf32> -> vector<24x32xf32>
    %126 = arith.addf %102, %125 : vector<24x32xf32>
    %c0_50 = arith.constant 0 : index
    %c0_51 = arith.constant 0 : index
    %c0_52 = arith.constant 0 : index
    %127 = vector.load %arg9[%c0_50, %c0_51, %c0_52] : memref<1x1x32xf32, #tpu.memory_space<vmem>>, vector<1x1x32xf32>
    %128 = vector.shape_cast %127 : vector<1x1x32xf32> to vector<1x32xf32>
    %c0_53 = arith.constant 0 : index
    %c0_54 = arith.constant 0 : index
    %c0_55 = arith.constant 0 : index
    %129 = vector.load %arg10[%c0_53, %c0_54, %c0_55] : memref<1x1x32xf32, #tpu.memory_space<vmem>>, vector<1x1x32xf32>
    %130 = vector.shape_cast %129 : vector<1x1x32xf32> to vector<1x32xf32>
    %cst_56 = arith.constant dense<0.000000e+00> : vector<24xf32>
    %131 = vector.multi_reduction <add>, %126, %cst_56 [1] : vector<24x32xf32> to vector<24xf32>
    %132 = vector.shape_cast %131 : vector<24xf32> to vector<24x1xf32>
    %cst_57 = arith.constant 3.200000e+01 : f32
    %133 = vector.broadcast %cst_57 : f32 to vector<24x1xf32>
    %134 = arith.divf %132, %133 : vector<24x1xf32>
    %135 = vector.broadcast %134 : vector<24x1xf32> to vector<24x32xf32>
    %136 = arith.subf %126, %135 : vector<24x32xf32>
    %137 = arith.mulf %136, %136 : vector<24x32xf32>
    %cst_58 = arith.constant dense<0.000000e+00> : vector<24xf32>
    %138 = vector.multi_reduction <add>, %137, %cst_58 [1] : vector<24x32xf32> to vector<24xf32>
    %139 = vector.shape_cast %138 : vector<24xf32> to vector<24x1xf32>
    %cst_59 = arith.constant 3.200000e+01 : f32
    %140 = vector.broadcast %cst_59 : f32 to vector<24x1xf32>
    %141 = arith.divf %139, %140 : vector<24x1xf32>
    %142 = vector.broadcast %134 : vector<24x1xf32> to vector<24x32xf32>
    %143 = arith.subf %126, %142 : vector<24x32xf32>
    %cst_60 = arith.constant 9.99999996E-13 : f32
    %144 = vector.broadcast %cst_60 : f32 to vector<24x1xf32>
    %145 = arith.addf %141, %144 : vector<24x1xf32>
    %146 = math.rsqrt %145 : vector<24x1xf32>
    %147 = vector.broadcast %146 : vector<24x1xf32> to vector<24x32xf32>
    %148 = arith.mulf %143, %147 : vector<24x32xf32>
    %149 = vector.broadcast %128 : vector<1x32xf32> to vector<24x32xf32>
    %150 = arith.mulf %148, %149 : vector<24x32xf32>
    %151 = vector.broadcast %130 : vector<1x32xf32> to vector<24x32xf32>
    %152 = arith.addf %150, %151 : vector<24x32xf32>
    %153 = arith.truncf %152 : vector<24x32xf32> to vector<24x32xbf16>
    %c0_61 = arith.constant 0 : index
    %c0_62 = arith.constant 0 : index
    %c0_63 = arith.constant 0 : index
    %154 = vector.load %arg11[%c0_61, %c0_62, %c0_63] : memref<1x32x64xbf16, #tpu.memory_space<vmem>>, vector<1x32x64xbf16>
    %155 = vector.shape_cast %154 : vector<1x32x64xbf16> to vector<32x64xbf16>
    %cst_64 = arith.constant dense<0.000000e+00> : vector<24x64xf32>
    %156 = tpu.matmul %153, %155, %cst_64 {dimension_numbers = #tpu.dot_dimension_numbers<[1], [0], [0], [1], [0, 0, 1, 1], [], []>} : vector<24x32xbf16>, vector<32x64xbf16>, vector<24x64xf32> -> vector<24x64xf32>
    %c0_65 = arith.constant 0 : index
    %c0_66 = arith.constant 0 : index
    %c0_67 = arith.constant 0 : index
    %157 = vector.load %arg12[%c0_65, %c0_66, %c0_67] : memref<1x1x64xf32, #tpu.memory_space<vmem>>, vector<1x1x64xf32>
    %158 = vector.shape_cast %157 : vector<1x1x64xf32> to vector<1x64xf32>
    %159 = vector.broadcast %158 : vector<1x64xf32> to vector<24x64xf32>
    %160 = arith.addf %156, %159 : vector<24x64xf32>
    %cst_68 = arith.constant 5.000000e-01 : f32
    %161 = vector.broadcast %cst_68 : f32 to vector<24x64xf32>
    %162 = arith.mulf %161, %160 : vector<24x64xf32>
    %cst_69 = arith.constant 4.471500e-02 : f32
    %163 = vector.broadcast %cst_69 : f32 to vector<24x64xf32>
    %164 = arith.mulf %163, %160 : vector<24x64xf32>
    %165 = arith.mulf %164, %160 : vector<24x64xf32>
    %166 = arith.mulf %165, %160 : vector<24x64xf32>
    %167 = arith.addf %160, %166 : vector<24x64xf32>
    %cst_70 = arith.constant 0.797884583 : f32
    %168 = vector.broadcast %cst_70 : f32 to vector<24x64xf32>
    %169 = arith.mulf %168, %167 : vector<24x64xf32>
    %170 = math.tanh %169 : vector<24x64xf32>
    %cst_71 = arith.constant 1.000000e+00 : f32
    %171 = vector.broadcast %cst_71 : f32 to vector<24x64xf32>
    %172 = arith.addf %171, %170 : vector<24x64xf32>
    %173 = arith.mulf %162, %172 : vector<24x64xf32>
    %174 = arith.truncf %173 : vector<24x64xf32> to vector<24x64xbf16>
    %c0_72 = arith.constant 0 : index
    %c0_73 = arith.constant 0 : index
    %c0_74 = arith.constant 0 : index
    %175 = vector.load %arg13[%c0_72, %c0_73, %c0_74] : memref<1x64x32xbf16, #tpu.memory_space<vmem>>, vector<1x64x32xbf16>
    %176 = vector.shape_cast %175 : vector<1x64x32xbf16> to vector<64x32xbf16>
    %cst_75 = arith.constant dense<0.000000e+00> : vector<24x32xf32>
    %177 = tpu.matmul %174, %176, %cst_75 {dimension_numbers = #tpu.dot_dimension_numbers<[1], [0], [0], [1], [0, 0, 1, 1], [], []>} : vector<24x64xbf16>, vector<64x32xbf16>, vector<24x32xf32> -> vector<24x32xf32>
    %c0_76 = arith.constant 0 : index
    %c0_77 = arith.constant 0 : index
    %c0_78 = arith.constant 0 : index
    %178 = vector.load %arg14[%c0_76, %c0_77, %c0_78] : memref<1x1x32xf32, #tpu.memory_space<vmem>>, vector<1x1x32xf32>
    %179 = vector.shape_cast %178 : vector<1x1x32xf32> to vector<1x32xf32>
    %180 = vector.broadcast %179 : vector<1x32xf32> to vector<24x32xf32>
    %181 = arith.addf %177, %180 : vector<24x32xf32>
    %182 = arith.addf %181, %152 : vector<24x32xf32>
    %c0_79 = arith.constant 0 : index
    %c0_80 = arith.constant 0 : index
    %c0_81 = arith.constant 0 : index
    %183 = vector.load %arg15[%c0_79, %c0_80, %c0_81] : memref<1x1x32xf32, #tpu.memory_space<vmem>>, vector<1x1x32xf32>
    %184 = vector.shape_cast %183 : vector<1x1x32xf32> to vector<1x32xf32>
    %c0_82 = arith.constant 0 : index
    %c0_83 = arith.constant 0 : index
    %c0_84 = arith.constant 0 : index
    %185 = vector.load %arg16[%c0_82, %c0_83, %c0_84] : memref<1x1x32xf32, #tpu.memory_space<vmem>>, vector<1x1x32xf32>
    %186 = vector.shape_cast %185 : vector<1x1x32xf32> to vector<1x32xf32>
    %cst_85 = arith.constant dense<0.000000e+00> : vector<24xf32>
    %187 = vector.multi_reduction <add>, %182, %cst_85 [1] : vector<24x32xf32> to vector<24xf32>
    %188 = vector.shape_cast %187 : vector<24xf32> to vector<24x1xf32>
    %cst_86 = arith.constant 3.200000e+01 : f32
    %189 = vector.broadcast %cst_86 : f32 to vector<24x1xf32>
    %190 = arith.divf %188, %189 : vector<24x1xf32>
    %191 = vector.broadcast %190 : vector<24x1xf32> to vector<24x32xf32>
    %192 = arith.subf %182, %191 : vector<24x32xf32>
    %193 = arith.mulf %192, %192 : vector<24x32xf32>
    %cst_87 = arith.constant dense<0.000000e+00> : vector<24xf32>
    %194 = vector.multi_reduction <add>, %193, %cst_87 [1] : vector<24x32xf32> to vector<24xf32>
    %195 = vector.shape_cast %194 : vector<24xf32> to vector<24x1xf32>
    %cst_88 = arith.constant 3.200000e+01 : f32
    %196 = vector.broadcast %cst_88 : f32 to vector<24x1xf32>
    %197 = arith.divf %195, %196 : vector<24x1xf32>
    %198 = vector.broadcast %190 : vector<24x1xf32> to vector<24x32xf32>
    %199 = arith.subf %182, %198 : vector<24x32xf32>
    %cst_89 = arith.constant 9.99999996E-13 : f32
    %200 = vector.broadcast %cst_89 : f32 to vector<24x1xf32>
    %201 = arith.addf %197, %200 : vector<24x1xf32>
    %202 = math.rsqrt %201 : vector<24x1xf32>
    %203 = vector.broadcast %202 : vector<24x1xf32> to vector<24x32xf32>
    %204 = arith.mulf %199, %203 : vector<24x32xf32>
    %205 = vector.broadcast %184 : vector<1x32xf32> to vector<24x32xf32>
    %206 = arith.mulf %204, %205 : vector<24x32xf32>
    %207 = vector.broadcast %186 : vector<1x32xf32> to vector<24x32xf32>
    %208 = arith.addf %206, %207 : vector<24x32xf32>
    %c0_90 = arith.constant 0 : index
    %c0_91 = arith.constant 0 : index
    %209 = vector.load %arg18[%c0_90, %c0_91] : memref<24x32xf32, #tpu.memory_space<vmem>>, vector<24x32xf32>
    tpu.vector_store %arg18[%c0_90, %c0_91], %208 {strides = array<i32>} : memref<24x32xf32, #tpu.memory_space<vmem>>, vector<24x32xf32>,
    %c1_i32 = arith.constant 1 : i32
    %210 = arith.cmpi eq, %arg1, %c1_i32 : i32
    %211 = arith.extui %210 : i1 to i32
    %c0_i32_92 = arith.constant 0 : i32
    %212 = arith.cmpi ne, %211, %c0_i32_92 : i32
    scf.if %212 {
      %c0_93 = arith.constant 0 : index
      %c0_94 = arith.constant 0 : index
      %c0_95 = arith.constant 0 : index
      %213 = vector.load %arg17[%c0_93, %c0_94, %c0_95] : memref<1x24x32xf32, #tpu.memory_space<vmem>>, vector<1x24x32xf32>
      %214 = vector.shape_cast %213 : vector<1x24x32xf32> to vector<24x32xf32>
      %215 = vector.shape_cast %208 : vector<24x32xf32> to vector<1x24x32xf32>
      tpu.vector_store %arg17[%c0_93, %c0_94, %c0_95], %215 {strides = array<i32>} : memref<1x24x32xf32, #tpu.memory_space<vmem>>, vector<1x24x32xf32>,
    } else {
    }
    return
  }
  func.func @transform_0(%arg0: i32, %arg1: i32) -> (i32, i32, i32) {
    %c0_i32 = arith.constant 0 : i32
    %c0_i32_0 = arith.constant 0 : i32
    %c0_i32_1 = arith.constant 0 : i32
    return %arg0, %c0_i32, %c0_i32_0 : i32, i32, i32
  }
  func.func @transform_1(%arg0: i32, %arg1: i32) -> (i32, i32, i32) {
    %c0_i32 = arith.constant 0 : i32
    %c0_i32_0 = arith.constant 0 : i32
    %c0_i32_1 = arith.constant 0 : i32
    return %arg0, %c0_i32, %c0_i32_0 : i32, i32, i32
  }
  func.func @transform_2(%arg0: i32, %arg1: i32) -> (i32, i32) {
    %c0_i32 = arith.constant 0 : i32
    %c0_i32_0 = arith.constant 0 : i32
    %c0_i32_1 = arith.constant 0 : i32
    return %c0_i32, %c0_i32_0 : i32, i32
  }
  func.func @transform_3(%arg0: i32, %arg1: i32) -> (i32, i32, i32) {
    %c0_i32 = arith.constant 0 : i32
    %c0_i32_0 = arith.constant 0 : i32
    %c0_i32_1 = arith.constant 0 : i32
    return %arg1, %c0_i32, %c0_i32_0 : i32, i32, i32
  }
  func.func @transform_4(%arg0: i32, %arg1: i32) -> (i32, i32, i32) {
    %c0_i32 = arith.constant 0 : i32
    %c0_i32_0 = arith.constant 0 : i32
    %c0_i32_1 = arith.constant 0 : i32
    return %arg1, %c0_i32, %c0_i32_0 : i32, i32, i32
  }
  func.func @transform_5(%arg0: i32, %arg1: i32) -> (i32, i32, i32) {
    %c0_i32 = arith.constant 0 : i32
    %c0_i32_0 = arith.constant 0 : i32
    %c0_i32_1 = arith.constant 0 : i32
    return %arg1, %c0_i32, %c0_i32_0 : i32, i32, i32
  }
  func.func @transform_6(%arg0: i32, %arg1: i32) -> (i32, i32, i32) {
    %c0_i32 = arith.constant 0 : i32
    %c0_i32_0 = arith.constant 0 : i32
    %c0_i32_1 = arith.constant 0 : i32
    return %arg1, %c0_i32, %c0_i32_0 : i32, i32, i32
  }
  func.func @transform_7(%arg0: i32, %arg1: i32) -> (i32, i32, i32) {
    %c0_i32 = arith.constant 0 : i32
    %c0_i32_0 = arith.constant 0 : i32
    %c0_i32_1 = arith.constant 0 : i32
    return %arg1, %c0_i32, %c0_i32_0 : i32, i32, i32
  }
  func.func @transform_8(%arg0: i32, %arg1: i32) -> (i32, i32, i32) {
    %c0_i32 = arith.constant 0 : i32
    %c0_i32_0 = arith.constant 0 : i32
    %c0_i32_1 = arith.constant 0 : i32
    return %arg1, %c0_i32, %c0_i32_0 : i32, i32, i32
  }
  func.func @transform_9(%arg0: i32, %arg1: i32) -> (i32, i32, i32) {
    %c0_i32 = arith.constant 0 : i32
    %c0_i32_0 = arith.constant 0 : i32
    %c0_i32_1 = arith.constant 0 : i32
    return %arg1, %c0_i32, %c0_i32_0 : i32, i32, i32
  }
  func.func @transform_10(%arg0: i32, %arg1: i32) -> (i32, i32, i32) {
    %c0_i32 = arith.constant 0 : i32
    %c0_i32_0 = arith.constant 0 : i32
    %c0_i32_1 = arith.constant 0 : i32
    return %arg1, %c0_i32, %c0_i32_0 : i32, i32, i32
  }
  func.func @transform_11(%arg0: i32, %arg1: i32) -> (i32, i32, i32) {
    %c0_i32 = arith.constant 0 : i32
    %c0_i32_0 = arith.constant 0 : i32
    %c0_i32_1 = arith.constant 0 : i32
    return %arg1, %c0_i32, %c0_i32_0 : i32, i32, i32
  }
  func.func @transform_12(%arg0: i32, %arg1: i32) -> (i32, i32, i32) {
    %c0_i32 = arith.constant 0 : i32
    %c0_i32_0 = arith.constant 0 : i32
    %c0_i32_1 = arith.constant 0 : i32
    return %arg1, %c0_i32, %c0_i32_0 : i32, i32, i32
  }
  func.func @transform_13(%arg0: i32, %arg1: i32) -> (i32, i32, i32) {
    %c0_i32 = arith.constant 0 : i32
    %c0_i32_0 = arith.constant 0 : i32
    %c0_i32_1 = arith.constant 0 : i32
    return %arg1, %c0_i32, %c0_i32_0 : i32, i32, i32
  }
  func.func @transform_14(%arg0: i32, %arg1: i32) -> (i32, i32, i32) {
    %c0_i32 = arith.constant 0 : i32
    %c0_i32_0 = arith.constant 0 : i32
    %c0_i32_1 = arith.constant 0 : i32
    return %arg1, %c0_i32, %c0_i32_0 : i32, i32, i32
  }
  func.func @transform_15(%arg0: i32, %arg1: i32) -> (i32, i32, i32) {
    %c0_i32 = arith.constant 0 : i32
    %c0_i32_0 = arith.constant 0 : i32
    %c0_i32_1 = arith.constant 0 : i32
    return %arg0, %c0_i32, %c0_i32_0 : i32, i32, i32
  }
}

</mosaic_0001>

<bundles_post_ra>
// kernel: tpu_custom_call.1
= control target key start
LH: loop header
LB: loop body
LE: loop exit
PB: predicated region body
PF: predicated region fallthrough
CT: control target
= control target key end

     0   :  { %s3664_s0 = inlined_call_operand.hbm [shape: f32[1,24,32], index: 0, kind: input, shape index: {}]   ;;  %s3665_s1 = inlined_call_operand.hbm [shape: f32[1,24,24], index: 1, kind: input, shape index: {}]   ;;  %s3666_s2 = inlined_call_operand.hbm [shape: f32[24,32], index: 2, kind: input, shape index: {}]   ;;  %s3667_s3 = inlined_call_operand.vmem [shape: bf16[2,32,128], index: 3, kind: input, shape index: {}]   ;;  %s3668_s4 = inlined_call_operand.vmem [shape: f32[2,1,128], index: 4, kind: input, shape index: {}]   ;;  %s3669_s5 = inlined_call_operand.vmem [shape: bf16[2,32,32], index: 5, kind: input, shape index: {}]   ;;  %s3670_s6 = inlined_call_operand.vmem [shape: f32[2,1,32], index: 6, kind: input, shape index: {}]   ;;  %s3671_s7 = inlined_call_operand.vmem [shape: f32[2,1,32], index: 7, kind: input, shape index: {}]   ;;  %s3672_s8 = inlined_call_operand.vmem [shape: f32[2,1,32], index: 8, kind: input, shape index: {}]   ;;  %s3673_s9 = inlined_call_operand.vmem [shape: bf16[2,32,64], index: 9, kind: input, shape index: {}]   ;;  %s3674_s10 = inlined_call_operand.hbm [shape: f32[2,1,64], index: 10, kind: input, shape index: {}]   ;;  %s3675_s11 = inlined_call_operand.vmem [shape: bf16[2,64,32], index: 11, kind: input, shape index: {}]   ;;  %s3676_s12 = inlined_call_operand.vmem [shape: f32[2,1,32], index: 12, kind: input, shape index: {}]   ;;  %s3677_s13 = inlined_call_operand.vmem [shape: f32[2,1,32], index: 13, kind: input, shape index: {}]   ;;  %s3678_s14 = inlined_call_operand.vmem [shape: f32[2,1,32], index: 14, kind: input, shape index: {}]   ;;  %s3679_s15 = inlined_call_operand.hbm [shape: f32[1,24,32], index: 15, kind: output, shape index: {}]  }
   0x1   :  { %3688 = sst [smem:[#allocation19_spill]] %s3664_s0 }
   0x2   :  { %3689 = sst [smem:[#allocation20_spill]] %s3665_s1 }
   0x3   :  { %3690 = sst [smem:[#allocation21_spill]] %s3666_s2 }
   0x4   :  { %3691 = sst [smem:[#allocation22_spill]] %s3667_s3 }
   0x5   :  { %3692 = sst [smem:[#allocation23_spill]] %s3669_s5 }
   0x6   :  { %3693 = sst [smem:[#allocation24_spill]] %s3670_s6 }
   0x7   :  { %3694 = sst [smem:[#allocation25_spill]] %s3671_s7 }
   0x8   :  { %3695 = sst [smem:[#allocation26_spill]] %s3672_s8 }
   0x9   :  { %3696 = sst [smem:[#allocation27_spill]] %s3673_s9 }
   0xa   :  { %3697 = sst [smem:[#allocation28_spill]] %s3674_s10 }
   0xb   :  { %3698 = sst [smem:[#allocation29_spill]] %s3675_s11 }
   0xc   :  { %3699 = sst [smem:[#allocation30_spill]] %s3676_s12 }
   0xd   :  { %3700 = sst [smem:[#allocation31_spill]] %s3677_s13 }
   0xe   :  { %3701 = sst [smem:[#allocation32_spill]] %s3678_s14 }
   0xf   :  { %3702 = sst [smem:[#allocation33_spill]] %s3679_s15 }
  0x10   :  { %20 = vsyncpa [#allocation4], 0 }
  0x11   :  { %21 = vsyncpa [#allocation7], 0 }
  0x12   :  { %22 = vsyncpa [#allocation10], 0 }
  0x13   :  { %24 = vsyncpa [#allocation10 + $0x1], 0 }
  0x14   :  { %25 = vsyncpa [#allocation5], 0  ;;  %s3144_s18 = smov 0   ;;  %s3146_s19 = smov 0  }
  0x15   :  { %s3148_s20 = smov 0   ;;  %s3150_s21 = smov 0  }
  0x16   :  { %s3152_s22 = smov 0   ;;  %s3154_s23 = smov 0  }
  0x17 LB: > { %3703 = sst [smem:[#allocation16_spill]] %s3038_s22  ;;  %s3680_s24 = sadd.s32 4294967295, %s3042_s23   ;;  %s3042_s23 = sphi %s3154_s23, %s31_s23   ;;  %s3038_s22 = sphi %s3152_s22, %s3743_s22   ;;  %s3034_s21 = sphi %s3150_s21, %s3742_s21   ;;  %s3030_s20 = sphi %s3148_s20, %s3746_s20   ;;  %s3026_s19 = sphi %s3146_s19, %s3745_s19   ;;  %s3022_s18 = sphi %s3144_s18, %s3744_s18  }
  0x18   : > { %p318_p0 = scmp.ne.s32.totalorder %s3026_s19, %s3022_s18  ;;  %p3176_p1 = scmp.eq.s32.totalorder %s3680_s24, 0 }
  0x19   : > { %p2379_p2 = scmp.ge.s32.totalorder %s3042_s23, 1  ;;  %p459_p3 = scmp.lt.s32.totalorder %s3042_s23, 3 }
  0x1a   : > { %s3704_s25 = scalar_select %p3176_p1, 1, 0 }
  0x1b   : > { %p3184_p4 = por %p3176_p1, %p318_p0  ;;  %p3188_p5 = pnand %p2379_p2, %p459_p3 }
  0x1c   : > { %s3044_s28 = smov [#allocation6]   ;;  %s3045_s16 = smov [#allocation3]  }
  0x1d   : > { %s3705_s26 = scalar_select %p3184_p4, 1, 0 }
  0x1e   : > { %s3706_s27 = scalar_select %p3188_p5, 1, 0 }
  0x1f   : > { %p2676_p6 = pneg %p3188_p5  ;;  %s490_s29 = sshll.u32 %s3044_s28, 4  ;;  %s491_s29 = int_to_ptr.vmem [resolvable:$true] %s490_s29 }
  0x20   : > { %s474_s17 = sshll.u32 %s3045_s16, 4  ;;  %s3708_s1 = sld [smem:[#allocation20_spill]]  ;;  %s475_s17 = int_to_ptr.vmem [resolvable:$true] %s474_s17 }
  0x21   : > { %p3196_p7 = pnand %p2676_p6, %p3176_p1 }
  0x23   : > { %p3208_p9 = pneg %p3196_p7 }
  0x26   : > { %s2840_s15 = scalar_lea.hbm %s3708_s1, 384 }
  0x27   : > { %p2841_p8 = scmp.ne.s32.totalorder %s3708_s1, %s2840_s15  ;;  %p2847_p12 = scmp.lt.u32.totalorder %s2840_s15, %s3708_s1 }
  0x29   : > { %p2843_p10 = pnand %p3208_p9, %p2841_p8 }
  0x2b   : > { %p2844_p11 = pneg %p2843_p10 }
  0x2d   : > { %p2849_p13 = pnand %p2847_p12, %p2844_p11 }
  0x2f   : > { %2852 = shalt.err (!%p2849_p13)
}
  0x30   : > { %s2853_s24 = scalar_lea.vmem %s491_s29, 384  ;;  %p2861_p6 = scmp.lt.s32.totalorder %s491_s29, %s491_s29 }
  0x31   : > { %p2854_p0 = scmp.ne.s32.totalorder %s491_s29, %s2853_s24  ;;  %p2862_p4 = scmp.lt.s32.totalorder %s2853_s24, %s2853_s24 }
  0x33   : > { %p2856_p2 = pnand %p2854_p0, %p3208_p9  ;;  %p2863_p1 = por %p2862_p4, %p2861_p6 }
  0x35   : > { %p2857_p3 = pneg %p2856_p2 }
  0x37   : > { %p2864_p5 = pnand %p2863_p1, %p2857_p3 }
  0x39   : > { %2867 = shalt.err (!%p2864_p5)
}
  0x3a   : > { %s3046_s13 = smov 128   ;;  %s3047_s14 = smov 8  }
  0x3b   : > { %2682 = dma.hbm_to_vmem [thread:$0]  (!%p3196_p7), %s3708_s1, 384, %s491_s29, [#allocation7], %s3046_s13, %s3046_s13, %s3047_s14  }
  0x3c   : > { %s3048_s15 = smov [#allocation8]   ;;  %s3710_s0 = sld [smem:[#allocation19_spill]] }
  0x3d   : > { %s503_s16 = sshll.u32 %s3048_s15, 4  ;;  %s504_s16 = int_to_ptr.vmem [resolvable:$true] %s503_s16 }
  0x42   : > { %s2868_s9 = scalar_lea.hbm %s3710_s0, 384 }
  0x43   : > { %p2869_p1 = scmp.ne.s32.totalorder %s3710_s0, %s2868_s9  ;;  %p2875_p8 = scmp.lt.u32.totalorder %s2868_s9, %s3710_s0 }
  0x45   : > { %p2871_p4 = pnand %p2869_p1, %p3208_p9 }
  0x47   : > { %p2872_p5 = pneg %p2871_p4 }
  0x49   : > { %p2877_p10 = pnand %p2875_p8, %p2872_p5 }
  0x4b   : > { %2880 = shalt.err (!%p2877_p10)
}
  0x4c   : > { %s2881_s29 = scalar_lea.vmem %s475_s17, 384  ;;  %p2889_p0 = scmp.lt.s32.totalorder %s475_s17, %s475_s17 }
  0x4d   : > { %p2882_p11 = scmp.ne.s32.totalorder %s475_s17, %s2881_s29  ;;  %p2890_p2 = scmp.lt.s32.totalorder %s2881_s29, %s2881_s29 }
  0x4f   : > { %p2884_p12 = pnand %p2882_p11, %p3208_p9  ;;  %p2891_p3 = por %p2890_p2, %p2889_p0 }
  0x51   : > { %p2885_p13 = pneg %p2884_p12 }
  0x53   : > { %p2892_p6 = pnand %p2891_p3, %p2885_p13 }
  0x55   : > { %2895 = shalt.err (!%p2892_p6)
}
  0x56   : > { %2679 = dma.hbm_to_vmem [thread:$0]  (!%p3196_p7), %s3710_s0, 384, %s475_s17, [#allocation4], %s3046_s13, %s3046_s13, %s3047_s14  }
  0x57   : > { %s3711_s2 = sld [smem:[#allocation21_spill]] }
  0x5d   : > { %s2896_s9 = scalar_lea.hbm %s3711_s2, 384 }
  0x5e   : > { %p2897_p1 = scmp.ne.s32.totalorder %s3711_s2, %s2896_s9  ;;  %p2903_p8 = scmp.lt.u32.totalorder %s2896_s9, %s3711_s2 }
  0x60   : > { %p2899_p4 = pnand %p2897_p1, %p3208_p9 }
  0x62   : > { %p2900_p5 = pneg %p2899_p4 }
  0x64   : > { %p2905_p10 = pnand %p2903_p8, %p2900_p5 }
  0x66   : > { %2908 = shalt.err (!%p2905_p10)
}
  0x67   : > { %s2909_s24 = scalar_lea.vmem %s504_s16, 384  ;;  %p2917_p0 = scmp.lt.s32.totalorder %s504_s16, %s504_s16 }
  0x68   : > { %p2910_p11 = scmp.ne.s32.totalorder %s504_s16, %s2909_s24  ;;  %p2918_p2 = scmp.lt.s32.totalorder %s2909_s24, %s2909_s24 }
  0x6a   : > { %p2912_p12 = pnand %p2910_p11, %p3208_p9  ;;  %p2919_p3 = por %p2918_p2, %p2917_p0 }
  0x6c   : > { %p2913_p13 = pneg %p2912_p12 }
  0x6e   : > { %p2920_p6 = pnand %p2919_p3, %p2913_p13 }
  0x70   : > { %2923 = shalt.err (!%p2920_p6)
}
  0x71   : > { %2685 = dma.hbm_to_vmem [thread:$0]  (!%p3196_p7), %s3711_s2, 384, %s504_s16, [#allocation7], %s3046_s13, %s3046_s13, %s3047_s14  }
  0x72   : > { %s305_s28 = sadd.s32 1, %s3030_s20  ;;  %s40_s5 = sadd.s32 1, %s3038_s22 }
  0x73   : > { %p312_p9 = scmp.ne.s32.totalorder %s3030_s20, %s3026_s19  ;;  %p41_p1 = scmp.ge.s32.totalorder %s40_s5, 2 }
  0x74   : > { %p313_p4 = scmp.eq.s32.totalorder %s3042_s23, 0  ;;  %p2693_p5 = scmp.lt.s32.totalorder %s3042_s23, 2 }
  0x75   : > { %s565_s30 = sand.u32 1, %s3030_s20   ;;  %s3748_s5 = smov (%p41_p1, %s40_s5), 0 }
  0x76   : > { %3712 = sst [smem:[#allocation17_spill]] %s3748_s5  ;;  %p314_p8 = por %p313_p4, %p312_p9 }
  0x77   : > { %s302_s6 = ssub.s32 %s3038_s22, %s3748_s5  ;;  %s2384_s7 = sshll.u32 %s3038_s22, 4 }
  0x78   : > { %p303_p10 = scmp.eq.s32.totalorder %s302_s6, 0  ;;  %s3713_s10 = sld [smem:[#allocation28_spill]] }
  0x79   : > { %s568_s13 = scalar_lea.vmem [#allocation9], %s565_s30  ;;  %p3291_p7 = pnand %p2693_p5, %p314_p8 }
  0x7a   : > { %s575_s14 = sshll.u32 %s568_s13, 4  ;;  %s566_s15 = scalar_lea.sflag [#allocation10], %s565_s30  ;;  %s3289_s14 = int_to_ptr.vmem [resolvable:$true] %s575_s14 }
  0x7b   : > { %s3287_s16 = scalar_select %p303_p10, %s3030_s20, %s305_s28  }
  0x7c   : > { %p2926_p12 = pneg %p3291_p7 }
  0x7d   : > { %3714 = sst [smem:[#allocation18_spill]] %s3287_s16 }
  0x7e   : > { %s3284_s11 = scalar_lea.hbm %s3713_s10, %s2384_s7  ;;  %s2929_s29 = scalar_lea.hbm %s3713_s10, 32 }
  0x7f   : > { %s2924_s18 = scalar_lea.hbm %s3284_s11, 16  ;;  %p2930_p2 = scmp.lt.u32.totalorder %s3284_s11, %s3713_s10 }
  0x80   : > { %p2925_p11 = scmp.ne.s32.totalorder %s3284_s11, %s2924_s18  ;;  %p2931_p3 = scmp.lt.u32.totalorder %s2929_s29, %s2924_s18 }
  0x81   : > { %p2933_p9 = scmp.lt.u32.totalorder %s2924_s18, %s3284_s11 }
  0x82   : > { %p2927_p13 = pnand %p2926_p12, %p2925_p11  ;;  %p2932_p6 = por %p2931_p3, %p2930_p2 }
  0x84   : > { %p2928_p0 = pneg %p2927_p13  ;;  %p2934_p1 = por %p2933_p9, %p2932_p6 }
  0x86   : > { %p2935_p4 = pnand %p2934_p1, %p2928_p0 }
  0x88   : > { %2938 = shalt.err (!%p2935_p4)
}
  0x89   : > { %s2939_s30 = scalar_lea.vmem %s3289_s14, 16  ;;  %s3049_s7 = smov [#allocation9]  }
  0x8a   : > { %p2940_p5 = scmp.ne.s32.totalorder %s3289_s14, %s2939_s30  ;;  %s2944_s8 = sshll.u32 %s3049_s7, 4  ;;  %s2945_s8 = int_to_ptr.vmem [resolvable:$false] %s2944_s8 }
  0x8b   : > { %s2946_s9 = scalar_lea.vmem %s2945_s8, 32  ;;  %p2947_p11 = scmp.lt.s32.totalorder %s3289_s14, %s2945_s8 }
  0x8c   : > { %p2942_p8 = pnand %p2940_p5, %p2926_p12  ;;  %p2948_p13 = scmp.lt.s32.totalorder %s2946_s9, %s2939_s30 }
  0x8e   : > { %p2943_p10 = pneg %p2942_p8  ;;  %p2949_p2 = por %p2948_p13, %p2947_p11 }
  0x90   : > { %p2950_p3 = pnand %p2949_p2, %p2943_p10 }
  0x92   : > { %2953 = shalt.err (!%p2950_p3)
}
  0x93   : > { %2689 = dma.hbm_to_vmem [thread:$0]  (!%p3291_p7), %s3284_s11, 16, %s3289_s14, %s566_s15  }
  0x94   : > { %p3716_p0 = scmp.ne.s32.totalorder %s3706_s27, 0 }
  0x95   : > { %p3717_p12 = scmp.ne.s32.totalorder (!%p3716_p0), %s3704_s25, 0 }
  0x96   : > { %610 = sbr.rel (%p3716_p0) target bundleno = 3427 (0xd63), region = 80 }
  0x9d   : > { %3005 = dma.done.wait (%p3717_p12), [#allocation4], 384  }
  0x9e   : > { %3007 = vsyncadd (%p3717_p12), [#allocation4], 4294966912 }
  0x9f   : > { %3009 = dma.done.wait (%p3717_p12), [#allocation7], 768  }
  0xa0   : > { %3011 = vsyncadd (%p3717_p12), [#allocation7], 4294966528  ;;  %s624_s13 = sand.u32 1, %s3026_s19   ;;  %p3718_p7 = scmp.ne.s32.totalorder %s3705_s26, 0 }
  0xa1   : > { %s625_s12 = scalar_lea.sflag [#allocation10], %s624_s13  ;;  %s3331_s11 = scalar_lea.vmem [#allocation9], %s624_s13 }
  0xa2   : > { %3013 = dma.done.wait (%p3718_p7), %s625_s12, 16  }
  0xa3   : > { %3015 = vsyncadd (%p3718_p7), %s625_s12, 4294967280  ;;  %p709_p6 = scmp.lt.s32.totalorder %s3034_s21, 1  ;;  %s3719_s3 = sld [smem:[#allocation22_spill]] }
  0xa4   : > { %s3720_s6 = sld [smem:[#allocation23_spill]]  ;;  %s3722_s1 = sld [smem:[#allocation25_spill]] }
  0xa5   : > { %s3339_s27 = scalar_select %p709_p6, %s3034_s21, 1 }
  0xa6   : > { %s3724_s24 = sld [smem:[#allocation27_spill]]  ;;  %s3725_s22 = sld [smem:[#allocation30_spill]] }
  0xa7   : > { %s2449_s25 = sshll.u32 %s3339_s27, 4  ;;  %s2452_s29 = sshll.u32 %s3339_s27, 5 }
  0xa8   : > { %s3726_s9 = sld [smem:[#allocation29_spill]]  ;;  %s3727_s12 = sld [smem:[#allocation31_spill]] }
  0xa9   : > { %s713_s17 = scalar_lea.vmem %s3719_s3, %s2449_s25  ;;  %s3728_s26 = sld [smem:[#allocation32_spill]] }
  0xaa   : > { %s3352_s30 = scalar_lea.vmem %s3720_s6, %s2449_s25  ;;  %s727_s2 = scalar_lea.vmem %s3722_s1, %s3339_s27 }
  0xab   : > { %p2397_p9 = scmp.ne.s32.totalorder %s3034_s21, 0 }
  0xac   : > { %s3369_s3 = scalar_lea.vmem %s3724_s24, %s2449_s25  ;;  %s743_s16 = scalar_lea.vmem %s3725_s22, %s3339_s27  ;;  %v755_v0 = vld [vmem:[#allocation3] sm:$0xff] (!%p2397_p9)  ;;  %vm758_vm0 = vcmask (!%p2397_p9), 261120   ;;  %v756_v1 = vld [vmem:[#allocation3 + $0x8] sm:$0xff] (!%p2397_p9)  ;;  %v757_v2 = vld [vmem:[#allocation3 + $0x10] sm:$0xff] (!%p2397_p9) }
  0xad   : > { %754 = sbr.rel (%p2397_p9) target bundleno = 180 (0xb4), region = 100  ;;  %759 = vst.msk [vmem:[#allocation2] sm:$0xff] (!%p2397_p9), %vm758_vm0, %v755_v0  ;;  %760 = vst.msk [vmem:[#allocation2 + $0x8] sm:$0xff] (!%p2397_p9), %vm758_vm0, %v756_v1 }
  0xae   : > { %s3379_s13 = scalar_lea.vmem %s3726_s9, %s2452_s29  ;;  %s746_s10 = scalar_lea.vmem %s3727_s12, %s3339_s27  ;;  %761 = vst.msk [vmem:[#allocation2 + $0x10] sm:$0xff] (!%p2397_p9), %vm758_vm0, %v757_v2 }
  0xaf   : > { %s749_s5 = scalar_lea.vmem %s3728_s26, %s3339_s27 }
  0xb4 PF: > { %v2766_v3 = vld [vmem:[%s713_s17] sm:$0xff]   ;;  %v2767_v4 = vld [vmem:[%s713_s17 + $0x8] sm:$0xff]   ;;  %vm796_vm1 = vcmask 261120   ;;  %s3729_s26 = scalar_lea.vmem %s3668_s4, %s3339_s27  ;;  %s3050_s17 = smov 96   ;;  %v771_v23 = vld [vmem:[#allocation8 + $0x8] sm:$0xff]  ;;  %vm895_vm2 = vcmask 64512  }
  0xb5   : > { %2511 = vmatprep.subr.bf16.mxu1 %v2766_v3  ;;  %v3390_v5 = vld [vmem:[#allocation2] sm:$0xff]  ;;  %v3392_v6 = vld [vmem:[#allocation2 + $0x8] sm:$0xff]  ;;  %v3394_v7 = vld [vmem:[#allocation2 + $0x10] sm:$0xff]  ;;  %s3051_s18 = smov 64   ;;  %s3052_s24 = smov 56   ;;  %v855_v24 = vsub.f32 1.0, %v771_v23 }
  0xb6   : > { %2512 = vmatpush3.bf16.msra.mxu1 %v2766_v3  ;;  %v765_v8 = vpack.c.bf16 %v3392_v6, %v3390_v5  ;;  %v766_v9 = vpack.c.bf16 %v3394_v7, %v3394_v7  ;;  %v2398_v10 = vld [vmem:[%s3729_s26] ss:$0 sm:$0xff]  ;;  %v770_v20 = vld [vmem:[#allocation8] sm:$0xff]  ;;  %v772_v35 = vld [vmem:[#allocation8 + $0x10] sm:$0xff]  ;;  %s3053_s29 = smov 120   ;;  %vm962_vm3 = vcmask 195584  }
  0xb7   : > { %2513 = vmatprep.subr.bf16.mxu1 %v2767_v4  ;;  %v854_v21 = vsub.f32 1.0, %v770_v20  ;;  %v856_v37 = vsub.f32 1.0, %v772_v35  ;;  %v3435_v52 = vld [vmem:[#allocation6] sm:$0xff]  ;;  %v3437_v56 = vld [vmem:[#allocation6 + $0x8] sm:$0xff]  ;;  %v3440_v60 = vld [vmem:[#allocation6 + $0x10] sm:$0xff]  ;;  %s3054_s28 = smov 32  }
  0xb8   : > { %2515 = vmatprep.mubr.msk.bf16.mxu1 %vm796_vm1, %v765_v8  ;;  %s3055_s6 = smov 48   ;;  %s3056_s7 = smov 112   ;;  %vm1009_vm4 = vcmask 1043456   ;;  %vm2035_vm5 = vcmask 523264  }
  0xb9   : > { %s3057_s8 = smov 24   ;;  %s3058_s9 = smov 40  }
  0xba   : > { %2514 = vmatpush3.bf16.msra.mxu1 %v2767_v4  ;;  %s3059_s0 = smov 104   ;;  %s3060_s1 = smov 16  }
  0xbb   : > { %s3061_s12 = smov 8   ;;  %s3730_s15 = sld [smem:[#allocation24_spill]] }
  0xbc   : > { %p2444_p1 = scmp.ne.s32.totalorder %s3034_s21, 1 }
  0xbd   : > { %2516 = vmatmul.mubr.msk.bf16.vlgmr.msra.gmra.mrb[0].mxu1 %vm796_vm1, %v766_v9 }
  0xc1   : > { %s3731_s22 = scalar_lea.vmem %s3730_s15, %s3339_s27 }
 0x190   : > { %v2517_v11 = vpop.f32.mrb[0].mxu1 }
 0x191   : > { %v837_v12 = vpop.f32.mrb[1].mxu1  ;;  %v846_v17 = vadd.f32 %v2517_v11, %v2398_v10 }
 0x192   : > { %v838_v13 = vadd.f32 %v2398_v10, %v837_v12  ;;  %v2518_v14 = vpop.f32.mrb[2].mxu1 }
 0x193   : > { %v840_v15 = vpop.f32.mrb[3].mxu1  ;;  %v3410_v19 = vpack.c.bf16 %v846_v17, %v846_v17  ;;  %v853_v40 = vmul.f32 %v846_v17, %v772_v35 }
 0x194   : > { %v841_v16 = vadd.f32 %v2398_v10, %v840_v15  ;;  %860 = vrot.lane.b32.xlu1 %v838_v13, %s3050_s17  ;;  %v851_v28 = vmul.f32 %v838_v13, %v770_v20 }
 0x196   : > { %v3407_v18 = vpack.c.bf16 %v841_v16, %v838_v13  ;;  %v852_v29 = vmul.f32 %v841_v16, %v771_v23 }
 0x198   : > { %862 = vrot.lane.b32.xlu1 %v841_v16, %s3050_s17  ;;  %891 = vrot.lane.b32.xlu0 %v3407_v18, %s3051_s18 }
 0x19c   : > { %1130 = vrot.lane.b32.xlu1 %v3407_v18, %s3052_s24  ;;  %893 = vrot.lane.b32.xlu0 %v3410_v19, %s3051_s18 }
 0x1a0   : > { %864 = vrot.lane.b32.xlu0 %v846_v17, %s3050_s17 }
 0x1a4   : > { %1132 = vrot.lane.b32.xlu0 %v3410_v19, %s3052_s24  ;;  %s3733_s24 = sld [smem:[#allocation26_spill]] }
 0x206   : > { %v861_v22 = vpop.permute.xlu1 %860 }
 0x207   : > { %v869_v25 = vmul.f32 %v861_v22, %v854_v21 }
 0x209   : > { %v872_v32 = vadd.f32 %v869_v25, %v851_v28 }
 0x20a   : > { %v863_v26 = vpop.permute.xlu1 %862  ;;  %v892_v27 = vpop.permute.xlu0 %891 }
 0x20b   : > { %v870_v30 = vmul.f32 %v863_v26, %v855_v24  ;;  %v903_v31 = vsel %vm895_vm2, %v892_v27, 0  ;;  %2642 = vmatprep.subr.msk.bf16.mxu1 %vm895_vm2, %v892_v27 }
 0x20c   : > { %2520 = vmatpush3.bf16.xpose.msra.mxu1 %v903_v31 }
 0x20d   : > { %v873_v33 = vadd.f32 %v870_v30, %v852_v29 }
 0x20e   : > { %v894_v34 = vpop.permute.xlu0 %893  ;;  %v1131_v42 = vpop.permute.xlu1 %1130 }
 0x20f   : > { %v3417_v36 = vpack.c.bf16 %v873_v33, %v872_v32  ;;  %2643 = vmatprep.subr.msk.bf16.mxu1 %vm895_vm2, %v894_v34  ;;  %v906_v39 = vsel %vm895_vm2, %v894_v34, 0  ;;  %v1141_v45 = vsel %vm895_vm2, %v1131_v42, 0 }
 0x211   : > { %1126 = vrot.lane.b32.xlu1 %v3417_v36, %s3053_s29  ;;  %2523 = vmatprep.mubr.msk.bf16.mxu1 %vm895_vm2, %v3417_v36 }
 0x212   : > { %v865_v38 = vpop.permute.xlu0 %864 }
 0x213   : > { %v871_v41 = vmul.f32 %v865_v38, %v856_v37 }
 0x214   : > { %2522 = vmatpush3.bf16.xpose.msra.mxu1 %v906_v39 }
 0x215   : > { %v874_v43 = vadd.f32 %v871_v41, %v853_v40  ;;  %2646 = vmatprep.subr.msk.bf16.mxu1 %vm895_vm2, %v1131_v42 }
 0x216   : > { %v1133_v46 = vpop.permute.xlu0 %1132 }
 0x217   : > { %v3425_v44 = vpack.c.bf16 %v874_v43, %v874_v43  ;;  %v1144_v47 = vsel %vm895_vm2, %v1133_v46, 0 }
 0x219   : > { %1128 = vrot.lane.b32.xlu0 %v3425_v44, %s3053_s29  ;;  %s3734_s29 = scalar_lea.vmem %s3733_s24, %s3339_s27 }
 0x21b   : > { %2524 = vmatmul.mubr.msk.bf16.vlgmr.msra.gmra.mrb[4].mxu1 %vm895_vm2, %v3425_v44 }
 0x21c   : > { %2542 = vmatpush3.bf16.xpose.msra.mxu1 %v1141_v45 }
 0x21d   : > { %2647 = vmatprep.subr.msk.bf16.mxu1 %vm895_vm2, %v1133_v46 }
 0x224   : > { %2544 = vmatpush3.bf16.xpose.msra.mxu1 %v1144_v47 }
 0x283   : > { %v1127_v48 = vpop.permute.xlu1 %1126 }
 0x284   : > { %2545 = vmatprep.mubr.msk.bf16.mxu1 %vm895_vm2, %v1127_v48 }
 0x28b   : > { %v1129_v49 = vpop.permute.xlu0 %1128 }
 0x28c   : > { %2546 = vmatmul.mubr.msk.bf16.vlgmr.msra.gmra.mrb[8].mxu1 %vm895_vm2, %v1129_v49 }
 0x2ee   : > { %v2525_v50 = vpop.f32.mrb[4].mxu1 }
 0x2ef   : > { %v942_v51 = vpop.f32.mrb[5].mxu1  ;;  %v958_v57 = vmul.f32 0.35355338, %v2525_v50 }
 0x2f0   : > { %v956_v53 = vmul.f32 0.35355338, %v942_v51  ;;  %v2526_v54 = vpop.f32.mrb[6].mxu1 }
 0x2f1   : > { %v945_v55 = vpop.f32.mrb[7].mxu1  ;;  %v961_v0 = vadd.f32 %v958_v57, %v3440_v60 }
 0x2f2   : > { %v957_v58 = vmul.f32 0.35355338, %v945_v55  ;;  %v959_v59 = vadd.f32 %v956_v53, %v3435_v52 }
 0x2f3   : > { %v969_v1 = vsel %vm962_vm3, %v961_v0, -inf }
 0x2f4   : > { %v963_v61 = vsel %vm962_vm3, %v959_v59, -inf  ;;  %v960_v62 = vadd.f32 %v957_v58, %v3437_v56 }
 0x2f5   : > { %964 = vmax.xlane.f32.xlu1 %v963_v61 }
 0x2f6   : > { %v966_v63 = vsel %vm962_vm3, %v960_v62, -inf }
 0x2f7   : > { %967 = vmax.xlane.f32.xlu0 %v966_v63 }
 0x2fb   : > { %970 = vmax.xlane.f32.xlu0 %v969_v1 }
 0x35f   : > { %v2547_v2 = vpop.f32.mrb[8].mxu1 }
 0x360   : > { %v1180_v3 = vpop.f32.mrb[9].mxu1  ;;  %v1196_v27 = vmul.f32 0.35355338, %v2547_v2 }
 0x361   : > { %v2548_v4 = vpop.f32.mrb[10].mxu1  ;;  %v1194_v29 = vmul.f32 0.35355338, %v1180_v3 }
 0x362   : > { %v1183_v8 = vpop.f32.mrb[11].mxu1  ;;  %v1199_v31 = vadd.f32 %v1196_v27, %v3440_v60 }
 0x363   : > { %v1195_v26 = vmul.f32 0.35355338, %v1183_v8  ;;  %v1197_v33 = vadd.f32 %v1194_v29, %v3435_v52 }
 0x364   : > { %v1206_v32 = vsel %vm962_vm3, %v1199_v31, -inf }
 0x365   : > { %v1198_v28 = vadd.f32 %v1195_v26, %v3437_v56  ;;  %v1200_v34 = vsel %vm962_vm3, %v1197_v33, -inf }
 0x367   : > { %v1203_v30 = vsel %vm962_vm3, %v1198_v28, -inf }
 0x382   : > { %v965_v9 = vpop.xlane.xlu1 %964 }
 0x383   : > { %v972_v12 = vsub.f32 %v959_v59, %v965_v9 }
 0x384   : > { %v968_v10 = vpop.xlane.xlu0 %967 }
 0x385   : > { %v973_v11 = vsub.f32 %v960_v62, %v968_v10  ;;  %v975_v16 = vmul.f32 1.442695, %v972_v12 }
 0x387   : > { %v977_v13 = vmul.f32 1.442695, %v973_v11 }
 0x388   : > { %v971_v14 = vpop.xlane.xlu0 %970 }
 0x389   : > { %2774 = vpow2.f32 %v977_v13  ;;  %v974_v15 = vsub.f32 %v961_v0, %v971_v14  ;;  %v1063_v14 = vld [vmem:[%s3352_s30] sm:$0xf] }
 0x38b   : > { %v979_v17 = vmul.f32 1.442695, %v974_v15  ;;  %v1071_v15 = vsel %vm1009_vm4, %v1063_v14, 0 }
 0x38d   : > { %2776 = vpow2.f32 %v979_v17 }
 0x38e   : > { %2778 = vpow2.f32 %v975_v16 }
 0x393   : > { %v2775_v20 = vpop.eup %2774 }
 0x394   : > { %v984_v21 = vsel %vm962_vm3, %v2775_v20, 0.0 }
 0x395   : > { %985 = vadd.xlane.f32.xlu0 %v984_v21 }
 0x397   : > { %v2777_v22 = vpop.eup %2776 }
 0x398   : > { %v987_v23 = vsel %vm962_vm3, %v2777_v22, 0.0  ;;  %v2779_v24 = vpop.eup %2778 }
 0x399   : > { %988 = vadd.xlane.f32.xlu1 %v987_v23  ;;  %v981_v25 = vsel %vm962_vm3, %v2779_v24, 0.0 }
 0x39d   : > { %982 = vadd.xlane.f32.xlu1 %v981_v25 }
 0x3ab   : > { %998 = vrot.lane.b32.xlu0 %v3407_v18, %s3054_s28 }
 0x3ae   : > { %1000 = vrot.lane.b32.xlu1 %v3410_v19, %s3054_s28 }
 0x3af   : > { %1366 = vrot.lane.b32.xlu0 %v3410_v19, %s3055_s6 }
 0x3b2   : > { %1364 = vrot.lane.b32.xlu1 %v3407_v18, %s3055_s6 }
 0x3b3   : > { %1362 = vrot.lane.b32.xlu0 %v3425_v44, %s3056_s7 }
 0x3b6   : > { %1360 = vrot.lane.b32.xlu1 %v3417_v36, %s3056_s7 }
 0x3d2   : > { %1204 = vmax.xlane.f32.xlu0 %v1203_v30 }
 0x3d6   : > { %1207 = vmax.xlane.f32.xlu0 %v1206_v32 }
 0x3da   : > { %1201 = vmax.xlane.f32.xlu1 %v1200_v34 }
 0x422   : > { %v986_v35 = vpop.xlane.xlu0 %985 }
 0x426   : > { %v989_v37 = vpop.xlane.xlu1 %988  ;;  %v999_v38 = vpop.permute.xlu0 %998 }
 0x427   : > { %2527 = vmatprep.subr.bf16.mxu0 %v999_v38  ;;  %2780 = vrcp.f32 %v989_v37 }
 0x428   : > { %2528 = vmatpush3.bf16.msra.mxu0 %v999_v38  ;;  %2782 = vrcp.f32 %v986_v35 }
 0x42a   : > { %v983_v39 = vpop.xlane.xlu1 %982  ;;  %v1367_v47 = vpop.permute.xlu0 %1366 }
 0x42b   : > { %2784 = vrcp.f32 %v983_v39  ;;  %v1378_v57 = vsel %vm895_vm2, %v1367_v47, 0 }
 0x42e   : > { %v1001_v40 = vpop.permute.xlu1 %1000  ;;  %v1363_v58 = vpop.permute.xlu0 %1362 }
 0x42f   : > { %2644 = vmatprep.subr.msk.bf16.mxu0 %vm1009_vm4, %v1001_v40  ;;  %v1011_v41 = vsel %vm1009_vm4, %v1001_v40, 0 }
 0x430   : > { %2530 = vmatpush3.bf16.msra.mxu0 %v1011_v41 }
 0x431   : > { %v2781_v42 = vpop.eup %2780  ;;  %2645 = vmatprep.subr.msk.bf16.mxu0 %vm1009_vm4, %v1063_v14 }
 0x432   : > { %v1365_v43 = vpop.permute.xlu1 %1364  ;;  %v2783_v45 = vpop.eup %2782  ;;  %v995_v49 = vmul.f32 %v2781_v42, %v2777_v22 }
 0x433   : > { %v1375_v46 = vsel %vm895_vm2, %v1365_v43, 0  ;;  %2650 = vmatprep.subr.msk.bf16.mxu1 %vm895_vm2, %v1365_v43  ;;  %v994_v53 = vmul.f32 %v2783_v45, %v2775_v20 }
 0x434   : > { %2564 = vmatpush3.bf16.xpose.msra.mxu1 %v1375_v46  ;;  %v997_v55 = vpack.c.bf16 %v995_v49, %v995_v49 }
 0x435   : > { %v2785_v48 = vpop.eup %2784  ;;  %2651 = vmatprep.subr.msk.bf16.mxu1 %vm895_vm2, %v1367_v47 }
 0x436   : > { %v1361_v50 = vpop.permute.xlu1 %1360  ;;  %v993_v51 = vmul.f32 %v2785_v48, %v2779_v24 }
 0x437   : > { %2567 = vmatprep.mubr.msk.bf16.mxu1 %vm895_vm2, %v1361_v50 }
 0x438   : > { %v996_v54 = vpack.c.bf16 %v994_v53, %v993_v51 }
 0x43a   : > { %2531 = vmatprep.mubr.msk.bf16.mxu0 %vm962_vm3, %v996_v54 }
 0x43b   : > { %2532 = vmatmul.mubr.msk.bf16.vlgmr.msra.gmra.mrb[0].mxu0 %vm962_vm3, %v997_v55 }
 0x43c   : > { %2566 = vmatpush3.bf16.xpose.msra.mxu1 %v1378_v57  ;;  %2536 = vmatpush3.bf16.msra.mxu0 %v1071_v15 }
 0x443   : > { %2568 = vmatmul.mubr.msk.bf16.vlgmr.msra.gmra.mrb[12].mxu1 %vm895_vm2, %v1363_v58 }
 0x45f   : > { %v1205_v59 = vpop.xlane.xlu0 %1204 }
 0x460   : > { %v1210_v61 = vsub.f32 %v1198_v28, %v1205_v59  ;;  %v1299_v59 = vld [vmem:[%s3352_s30 + $0x4] sm:$0xf] }
 0x462   : > { %v1214_v62 = vmul.f32 1.442695, %v1210_v61  ;;  %v1307_v61 = vsel %vm1009_vm4, %v1299_v59, 0 }
 0x463   : > { %v1208_v63 = vpop.xlane.xlu0 %1207 }
 0x464   : > { %2786 = vpow2.f32 %v1214_v62  ;;  %v1211_v0 = vsub.f32 %v1199_v31, %v1208_v63 }
 0x466   : > { %v1216_v1 = vmul.f32 1.442695, %v1211_v0 }
 0x467   : > { %v1202_v2 = vpop.xlane.xlu1 %1201 }
 0x468   : > { %2788 = vpow2.f32 %v1216_v1  ;;  %v1209_v3 = vsub.f32 %v1197_v33, %v1202_v2 }
 0x46a   : > { %v1212_v4 = vmul.f32 1.442695, %v1209_v3 }
 0x46c   : > { %2790 = vpow2.f32 %v1212_v4 }
 0x46e   : > { %v2787_v8 = vpop.eup %2786 }
 0x46f   : > { %v1221_v9 = vsel %vm962_vm3, %v2787_v8, 0.0 }
 0x470   : > { %1222 = vadd.xlane.f32.xlu0 %v1221_v9 }
 0x472   : > { %v2789_v10 = vpop.eup %2788 }
 0x473   : > { %v1224_v11 = vsel %vm962_vm3, %v2789_v10, 0.0 }
 0x474   : > { %1225 = vadd.xlane.f32.xlu1 %v1224_v11 }
 0x476   : > { %v2791_v12 = vpop.eup %2790 }
 0x477   : > { %v1218_v13 = vsel %vm962_vm3, %v2791_v12, 0.0 }
 0x478   : > { %1219 = vadd.xlane.f32.xlu1 %v1218_v13 }
 0x486   : > { %1235 = vrot.lane.b32.xlu0 %v3407_v18, %s3057_s8 }
 0x489   : > { %1237 = vrot.lane.b32.xlu1 %v3410_v19, %s3057_s8 }
 0x48a   : > { %1600 = vrot.lane.b32.xlu0 %v3410_v19, %s3058_s9 }
 0x48d   : > { %1598 = vrot.lane.b32.xlu1 %v3407_v18, %s3058_s9 }
 0x48e   : > { %1596 = vrot.lane.b32.xlu0 %v3425_v44, %s3059_s0 }
 0x491   : > { %1594 = vrot.lane.b32.xlu1 %v3417_v36, %s3059_s0 }
 0x4fd   : > { %v1223_v16 = vpop.xlane.xlu0 %1222 }
 0x4fe   : > { %2792 = vrcp.f32 %v1223_v16 }
 0x501   : > { %v1226_v17 = vpop.xlane.xlu1 %1225  ;;  %v1236_v20 = vpop.permute.xlu0 %1235 }
 0x502   : > { %2549 = vmatprep.subr.bf16.mxu0 %v1236_v20 }
 0x505   : > { %v1220_v21 = vpop.xlane.xlu1 %1219  ;;  %v1601_v27 = vpop.permute.xlu0 %1600 }
 0x506   : > { %2794 = vrcp.f32 %v1220_v21  ;;  %v1612_v38 = vsel %vm895_vm2, %v1601_v27, 0 }
 0x507   : > { %2796 = vrcp.f32 %v1226_v17 }
 0x508   : > { %v2793_v24 = vpop.eup %2792 }
 0x509   : > { %v1238_v22 = vpop.permute.xlu1 %1237  ;;  %v1231_v32 = vmul.f32 %v2793_v24, %v2787_v8  ;;  %v1597_v54 = vpop.permute.xlu0 %1596 }
 0x50a   : > { %v1247_v45 = vsel %vm1009_vm4, %v1238_v22, 0 }
 0x50d   : > { %v1599_v23 = vpop.permute.xlu1 %1598 }
 0x50e   : > { %v1609_v25 = vsel %vm895_vm2, %v1599_v23, 0  ;;  %v2533_v26 = vpop.f32.mrb[0].mxu0  ;;  %2654 = vmatprep.subr.msk.bf16.mxu1 %vm895_vm2, %v1599_v23 }
 0x50f   : > { %v1047_v44 = vpop.f32.mrb[1].mxu0  ;;  %2586 = vmatpush3.bf16.xpose.msra.mxu1 %v1609_v25  ;;  %v1062_v34 = vpack.c.bf16 %v2533_v26, %v2533_v26 }
 0x510   : > { %v2795_v36 = vpop.eup %2794  ;;  %v2534_v28 = vpop.f32.mrb[2].mxu0  ;;  %2655 = vmatprep.subr.msk.bf16.mxu1 %vm895_vm2, %v1601_v27 }
 0x511   : > { %v1050_v29 = vpop.f32.mrb[3].mxu0  ;;  %v1595_v30 = vpop.permute.xlu1 %1594  ;;  %v1230_v31 = vmul.f32 %v2795_v36, %v2791_v12 }
 0x512   : > { %v1061_v33 = vpack.c.bf16 %v1050_v29, %v1047_v44  ;;  %2589 = vmatprep.mubr.msk.bf16.mxu1 %vm895_vm2, %v1595_v30  ;;  %v2797_v37 = vpop.eup %2796 }
 0x513   : > { %v1233_v35 = vpack.c.bf16 %v1231_v32, %v1230_v31  ;;  %v1232_v40 = vmul.f32 %v2797_v37, %v2789_v10 }
 0x514   : > { %2537 = vmatprep.mubr.msk.bf16.mxu0 %vm895_vm2, %v1061_v33 }
 0x515   : > { %2538 = vmatmul.mubr.msk.bf16.vlgmr.msra.gmra.mrb[4].mxu0 %vm895_vm2, %v1062_v34  ;;  %v1234_v50 = vpack.c.bf16 %v1232_v40, %v1232_v40 }
 0x516   : > { %2550 = vmatpush3.bf16.msra.mxu0 %v1236_v20  ;;  %2553 = vmatprep.mubr.msk.bf16.mxu0 %vm962_vm3, %v1233_v35  ;;  %v2569_v39 = vpop.f32.mrb[12].mxu1 }
 0x517   : > { %2648 = vmatprep.subr.msk.bf16.mxu0 %vm1009_vm4, %v1238_v22  ;;  %v1414_v41 = vpop.f32.mrb[13].mxu1  ;;  %2588 = vmatpush3.bf16.xpose.msra.mxu1 %v1612_v38  ;;  %v1430_v47 = vmul.f32 0.35355338, %v2569_v39 }
 0x518   : > { %v1428_v42 = vmul.f32 0.35355338, %v1414_v41  ;;  %v2570_v43 = vpop.f32.mrb[14].mxu1 }
 0x519   : > { %v1417_v46 = vpop.f32.mrb[15].mxu1  ;;  %v1433_v57 = vadd.f32 %v1430_v47, %v3440_v60 }
 0x51a   : > { %2552 = vmatpush3.bf16.msra.mxu0 %v1247_v45  ;;  %v1429_v48 = vmul.f32 0.35355338, %v1417_v46  ;;  %v1431_v49 = vadd.f32 %v1428_v42, %v3435_v52 }
 0x51b   : > { %v1440_v58 = vsel %vm962_vm3, %v1433_v57, -inf  ;;  %2649 = vmatprep.subr.msk.bf16.mxu0 %vm1009_vm4, %v1299_v59 }
 0x51c   : > { %v1434_v51 = vsel %vm962_vm3, %v1431_v49, -inf  ;;  %v1432_v53 = vadd.f32 %v1429_v48, %v3437_v56 }
 0x51d   : > { %1435 = vmax.xlane.f32.xlu1 %v1434_v51  ;;  %2554 = vmatmul.mubr.msk.bf16.vlgmr.msra.gmra.mrb[8].mxu0 %vm962_vm3, %v1234_v50 }
 0x51e   : > { %2590 = vmatmul.mubr.msk.bf16.vlgmr.msra.gmra.mrb[16].mxu1 %vm895_vm2, %v1597_v54  ;;  %v1437_v55 = vsel %vm962_vm3, %v1432_v53, -inf  ;;  %2558 = vmatpush3.bf16.msra.mxu0 %v1307_v61 }
 0x51f   : > { %1438 = vmax.xlane.f32.xlu0 %v1437_v55 }
 0x523   : > { %1441 = vmax.xlane.f32.xlu0 %v1440_v58 }
 0x5aa   : > { %v1436_v62 = vpop.xlane.xlu1 %1435 }
 0x5ab   : > { %v1443_v1 = vsub.f32 %v1431_v49, %v1436_v62 }
 0x5ac   : > { %v1439_v63 = vpop.xlane.xlu0 %1438 }
 0x5ad   : > { %v1444_v0 = vsub.f32 %v1432_v53, %v1439_v63  ;;  %v1446_v8 = vmul.f32 1.442695, %v1443_v1 }
 0x5af   : > { %v1448_v2 = vmul.f32 1.442695, %v1444_v0 }
 0x5b0   : > { %v1442_v3 = vpop.xlane.xlu0 %1441 }
 0x5b1   : > { %2798 = vpow2.f32 %v1448_v2  ;;  %v1445_v4 = vsub.f32 %v1433_v57, %v1442_v3  ;;  %v1533_v2 = vld [vmem:[%s3352_s30 + $0x8] sm:$0xf] }
 0x5b2   : > { %v1541_v3 = vsel %vm1009_vm4, %v1533_v2, 0 }
 0x5b3   : > { %v1450_v9 = vmul.f32 1.442695, %v1445_v4 }
 0x5b5   : > { %2800 = vpow2.f32 %v1450_v9 }
 0x5b6   : > { %2802 = vpow2.f32 %v1446_v8 }
 0x5bb   : > { %v2799_v10 = vpop.eup %2798 }
 0x5bc   : > { %v1455_v11 = vsel %vm962_vm3, %v2799_v10, 0.0 }
 0x5bd   : > { %1456 = vadd.xlane.f32.xlu0 %v1455_v11 }
 0x5bf   : > { %v2801_v12 = vpop.eup %2800 }
 0x5c0   : > { %v1458_v13 = vsel %vm962_vm3, %v2801_v12, 0.0  ;;  %v2803_v14 = vpop.eup %2802 }
 0x5c1   : > { %1459 = vadd.xlane.f32.xlu1 %v1458_v13  ;;  %v1452_v15 = vsel %vm962_vm3, %v2803_v14, 0.0 }
 0x5c5   : > { %1453 = vadd.xlane.f32.xlu1 %v1452_v15 }
 0x5d3   : > { %1469 = vrot.lane.b32.xlu0 %v3407_v18, %s3060_s1 }
 0x5d6   : > { %1471 = vrot.lane.b32.xlu1 %v3410_v19, %s3060_s1 }
 0x5f0   : > { %v2555_v16 = vpop.f32.mrb[8].mxu0 }
 0x5f1   : > { %v1283_v17 = vpop.f32.mrb[9].mxu0  ;;  %v2591_v20 = vpop.f32.mrb[16].mxu1  ;;  %v1298_v44 = vpack.c.bf16 %v2555_v16, %v2555_v16 }
 0x5f2   : > { %v2556_v21 = vpop.f32.mrb[10].mxu0  ;;  %v1648_v22 = vpop.f32.mrb[17].mxu1  ;;  %v1664_v36 = vmul.f32 0.35355338, %v2591_v20 }
 0x5f3   : > { %v1662_v23 = vmul.f32 0.35355338, %v1648_v22  ;;  %v1286_v24 = vpop.f32.mrb[11].mxu0  ;;  %v2592_v25 = vpop.f32.mrb[18].mxu1 }
 0x5f4   : > { %v1297_v26 = vpack.c.bf16 %v1286_v24, %v1283_v17  ;;  %v1651_v27 = vpop.f32.mrb[19].mxu1  ;;  %v1667_v33 = vadd.f32 %v1664_v36, %v3440_v60  ;;  %v1767_v25 = vld [vmem:[%s3352_s30 + $0xc] sm:$0xf] }
 0x5f5   : > { %v1663_v28 = vmul.f32 0.35355338, %v1651_v27  ;;  %v1665_v29 = vadd.f32 %v1662_v23, %v3435_v52 }
 0x5f6   : > { %2559 = vmatprep.mubr.msk.bf16.mxu0 %vm895_vm2, %v1297_v26  ;;  %v1674_v34 = vsel %vm962_vm3, %v1667_v33, -inf }
 0x5f7   : > { %2560 = vmatmul.mubr.msk.bf16.vlgmr.msra.gmra.mrb[4].mxu0 %vm895_vm2, %v1298_v44  ;;  %v1666_v30 = vadd.f32 %v1663_v28, %v3437_v56  ;;  %v1668_v32 = vsel %vm962_vm3, %v1665_v29, -inf  ;;  %v1775_v44 = vsel %vm1009_vm4, %v1767_v25, 0 }
 0x5f9   : > { %v1671_v31 = vsel %vm962_vm3, %v1666_v30, -inf }
 0x5fa   : > { %1672 = vmax.xlane.f32.xlu0 %v1671_v31  ;;  %1669 = vmax.xlane.f32.xlu1 %v1668_v32 }
 0x5fe   : > { %1675 = vmax.xlane.f32.xlu0 %v1674_v34 }
 0x64a   : > { %v1457_v35 = vpop.xlane.xlu0 %1456 }
 0x64e   : > { %v1460_v37 = vpop.xlane.xlu1 %1459  ;;  %v1470_v52 = vpop.permute.xlu0 %1469 }
 0x64f   : > { %2571 = vmatprep.subr.bf16.mxu0 %v1470_v52  ;;  %2804 = vrcp.f32 %v1460_v37 }
 0x650   : > { %2572 = vmatpush3.bf16.msra.mxu0 %v1470_v52  ;;  %2806 = vrcp.f32 %v1457_v35 }
 0x652   : > { %v1454_v38 = vpop.xlane.xlu1 %1453 }
 0x653   : > { %2808 = vrcp.f32 %v1454_v38 }
 0x656   : > { %v1472_v56 = vpop.permute.xlu1 %1471 }
 0x657   : > { %v1481_v39 = vsel %vm1009_vm4, %v1472_v56, 0  ;;  %2652 = vmatprep.subr.msk.bf16.mxu0 %vm1009_vm4, %v1472_v56 }
 0x658   : > { %2574 = vmatpush3.bf16.msra.mxu0 %v1481_v39 }
 0x659   : > { %v2805_v60 = vpop.eup %2804  ;;  %2653 = vmatprep.subr.msk.bf16.mxu0 %vm1009_vm4, %v1533_v2 }
 0x65a   : > { %v2807_v40 = vpop.eup %2806  ;;  %v1466_v42 = vmul.f32 %v2805_v60, %v2801_v12 }
 0x65b   : > { %v1465_v45 = vmul.f32 %v2807_v40, %v2799_v10 }
 0x65c   : > { %v1468_v47 = vpack.c.bf16 %v1466_v42, %v1466_v42 }
 0x65d   : > { %v2809_v41 = vpop.eup %2808 }
 0x65e   : > { %v1464_v43 = vmul.f32 %v2809_v41, %v2803_v14 }
 0x660   : > { %v1467_v46 = vpack.c.bf16 %v1465_v45, %v1464_v43 }
 0x662   : > { %2575 = vmatprep.mubr.msk.bf16.mxu0 %vm962_vm3, %v1467_v46 }
 0x663   : > { %2576 = vmatmul.mubr.msk.bf16.vlgmr.msra.gmra.mrb[12].mxu0 %vm962_vm3, %v1468_v47 }
 0x664   : > { %2580 = vmatpush3.bf16.msra.mxu0 %v1541_v3 }
 0x687   : > { %v1670_v48 = vpop.xlane.xlu1 %1669  ;;  %v1673_v49 = vpop.xlane.xlu0 %1672 }
 0x688   : > { %v1678_v50 = vsub.f32 %v1666_v30, %v1673_v49  ;;  %v1677_v51 = vsub.f32 %v1665_v29, %v1670_v48 }
 0x68a   : > { %v1682_v53 = vmul.f32 1.442695, %v1678_v50  ;;  %v1680_v57 = vmul.f32 1.442695, %v1677_v51 }
 0x68b   : > { %v1676_v54 = vpop.xlane.xlu0 %1675 }
 0x68c   : > { %v1679_v55 = vsub.f32 %v1667_v33, %v1676_v54  ;;  %2810 = vpow2.f32 %v1682_v53  ;;  %v2403_v33 = vld [vmem:[%s3731_s22] ss:$0 sm:$0xff] }
 0x68d   : > { %v886_v34 = vadd.f32 %v2403_v33, %v3390_v5  ;;  %v887_v37 = vadd.f32 %v2403_v33, %v3392_v6  ;;  %v888_v38 = vadd.f32 %v2403_v33, %v3394_v7 }
 0x68e   : > { %v1684_v58 = vmul.f32 1.442695, %v1679_v55 }
 0x690   : > { %2812 = vpow2.f32 %v1684_v58 }
 0x691   : > { %2814 = vpow2.f32 %v1680_v57 }
 0x696   : > { %v2811_v59 = vpop.eup %2810 }
 0x697   : > { %v1689_v61 = vsel %vm962_vm3, %v2811_v59, 0.0 }
 0x698   : > { %1690 = vadd.xlane.f32.xlu0 %v1689_v61  ;;  %v2768_v61 = vld [vmem:[%s3369_s3] sm:$0xff]  }
 0x699   : > { %2607 = vmatprep.subr.bf16.mxu1 %v2768_v61 }
 0x69a   : > { %v2813_v62 = vpop.eup %2812  ;;  %2608 = vmatpush3.bf16.msra.mxu1 %v2768_v61 }
 0x69b   : > { %v1692_v63 = vsel %vm962_vm3, %v2813_v62, 0.0  ;;  %v2815_v0 = vpop.eup %2814 }
 0x69c   : > { %1693 = vadd.xlane.f32.xlu1 %v1692_v63  ;;  %v1686_v1 = vsel %vm962_vm3, %v2815_v0, 0.0 }
 0x6a0   : > { %1687 = vadd.xlane.f32.xlu1 %v1686_v1 }
 0x6ae   : > { %1703 = vrot.lane.b32.xlu0 %v3407_v18, %s3061_s12 }
 0x6b1   : > { %1705 = vrot.lane.b32.xlu1 %v3410_v19, %s3061_s12 }
 0x725   : > { %v1691_v4 = vpop.xlane.xlu0 %1690 }
 0x726   : > { %2816 = vrcp.f32 %v1691_v4 }
 0x729   : > { %v1694_v8 = vpop.xlane.xlu1 %1693  ;;  %v1704_v9 = vpop.permute.xlu0 %1703 }
 0x72a   : > { %2593 = vmatprep.subr.bf16.mxu0 %v1704_v9 }
 0x72d   : > { %v1688_v10 = vpop.xlane.xlu1 %1687 }
 0x72e   : > { %2818 = vrcp.f32 %v1688_v10 }
 0x72f   : > { %2820 = vrcp.f32 %v1694_v8 }
 0x730   : > { %v2817_v11 = vpop.eup %2816 }
 0x731   : > { %v1699_v18 = vmul.f32 %v2817_v11, %v2811_v59  ;;  %v1706_v23 = vpop.permute.xlu1 %1705 }
 0x732   : > { %v1715_v26 = vsel %vm1009_vm4, %v1706_v23, 0 }
 0x736   : > { %v2577_v12 = vpop.f32.mrb[12].mxu0 }
 0x737   : > { %v1517_v13 = vpop.f32.mrb[13].mxu0  ;;  %v1532_v21 = vpack.c.bf16 %v2577_v12, %v2577_v12  ;;  %v2428_v12 = vld [vmem:[%s727_s2] ss:$0 sm:$0xff] }
 0x738   : > { %v2819_v14 = vpop.eup %2818  ;;  %v2578_v15 = vpop.f32.mrb[14].mxu0 }
 0x739   : > { %v1520_v16 = vpop.f32.mrb[15].mxu0  ;;  %v1698_v17 = vmul.f32 %v2819_v14, %v2815_v0  ;;  %v2821_v22 = vpop.eup %2820 }
 0x73a   : > { %v1531_v20 = vpack.c.bf16 %v1520_v16, %v1517_v13  ;;  %v1700_v24 = vmul.f32 %v2821_v22, %v2813_v62  ;;  %v2769_v62 = vld [vmem:[%s3369_s3 + $0x8] sm:$0xff]  }
 0x73b   : > { %v1701_v19 = vpack.c.bf16 %v1699_v18, %v1698_v17  ;;  %2609 = vmatprep.subr.bf16.mxu1 %v2769_v62  ;;  %v2429_v17 = vld [vmem:[%s3734_s29] ss:$0 sm:$0xff] }
 0x73c   : > { %2581 = vmatprep.mubr.msk.bf16.mxu0 %vm895_vm2, %v1531_v20  ;;  %v1702_v27 = vpack.c.bf16 %v1700_v24, %v1700_v24  ;;  %2610 = vmatpush3.bf16.msra.mxu1 %v2769_v62 }
 0x73d   : > { %2582 = vmatmul.mubr.msk.bf16.vlgmr.msra.gmra.mrb[4].mxu0 %vm895_vm2, %v1532_v21 }
 0x73e   : > { %2594 = vmatpush3.bf16.msra.mxu0 %v1704_v9  ;;  %2597 = vmatprep.mubr.msk.bf16.mxu0 %vm962_vm3, %v1701_v19 }
 0x73f   : > { %2656 = vmatprep.subr.msk.bf16.mxu0 %vm1009_vm4, %v1706_v23 }
 0x742   : > { %2596 = vmatpush3.bf16.msra.mxu0 %v1715_v26 }
 0x743   : > { %2657 = vmatprep.subr.msk.bf16.mxu0 %vm1009_vm4, %v1767_v25 }
 0x745   : > { %2598 = vmatmul.mubr.msk.bf16.vlgmr.msra.gmra.mrb[16].mxu0 %vm962_vm3, %v1702_v27  ;;  %v2770_v27 = vld [vmem:[%s3379_s13] sm:$0xff]  }
 0x746   : > { %2602 = vmatpush3.bf16.msra.mxu0 %v1775_v44  ;;  %v2771_v44 = vld [vmem:[%s3379_s13 + $0x8] sm:$0xff]  }
 0x747   : > { %2615 = vmatprep.subr.bf16.mxu0 %v2770_v27 }
 0x818   : > { %v2599_v36 = vpop.f32.mrb[16].mxu0 }
 0x819   : > { %v1751_v28 = vpop.f32.mrb[17].mxu0  ;;  %v1766_v32 = vpack.c.bf16 %v2599_v36, %v2599_v36  ;;  %v2772_v36 = vld [vmem:[%s3379_s13 + $0x10] sm:$0xff]  }
 0x81a   : > { %v2600_v29 = vpop.f32.mrb[18].mxu0 }
 0x81b   : > { %v1754_v30 = vpop.f32.mrb[19].mxu0  ;;  %v2430_v29 = vld [vmem:[%s3331_s11] ss:$0 sm:$0xff] }
 0x81c   : > { %v1765_v31 = vpack.c.bf16 %v1754_v30, %v1751_v28  ;;  %v2773_v28 = vld [vmem:[%s3379_s13 + $0x18] sm:$0xff]  }
 0x81e   : > { %2603 = vmatprep.mubr.msk.bf16.mxu0 %vm895_vm2, %v1765_v31 }
 0x81f   : > { %2604 = vmatmul.mubr.msk.bf16.vlgmr.msra.gmra.mrb[4].mxu0 %vm895_vm2, %v1766_v32 }
 0x820   : > { %2616 = vmatpush3.bf16.msra.mxu0 %v2770_v27 }
 0x821   : > { %2617 = vmatprep.subr.bf16.mxu0 %v2771_v44 }
 0x824   : > { %2618 = vmatpush3.bf16.msra.mxu0 %v2771_v44 }
 0x825   : > { %2619 = vmatprep.subr.bf16.mxu0 %v2772_v36 }
 0x828   : > { %2620 = vmatpush3.bf16.msra.mxu0 %v2772_v36 }
 0x829   : > { %2621 = vmatprep.subr.bf16.mxu0 %v2773_v28 }
 0x82c   : > { %2622 = vmatpush3.bf16.msra.mxu0 %v2773_v28 }
 0x8f2   : > { %v2605_v35 = vpop.f32.mrb[4].mxu0 }
 0x8f3   : > { %v1811_v52 = vpop.f32.mrb[5].mxu0  ;;  %v2627_v42 = vadd.f32 %v2605_v35, %v888_v38 }
 0x8f4   : > { %v2628_v56 = vadd.f32 %v1811_v52, %v886_v34  ;;  %v2606_v39 = vpop.f32.mrb[6].mxu0 }
 0x8f5   : > { %v1814_v60 = vpop.f32.mrb[7].mxu0  ;;  %v1836_v45 = vsel %vm796_vm1, %v2627_v42, 0.0 }
 0x8f6   : > { %v2629_v40 = vadd.f32 %v1814_v60, %v887_v37  ;;  %v1830_v41 = vsel %vm796_vm1, %v2628_v56, 0.0 }
 0x8f7   : > { %1831 = vadd.xlane.f32.xlu1 %v1830_v41 }
 0x8f8   : > { %v1833_v43 = vsel %vm796_vm1, %v2629_v40, 0.0 }
 0x8f9   : > { %1834 = vadd.xlane.f32.xlu0 %v1833_v43 }
 0x8fd   : > { %1837 = vadd.xlane.f32.xlu0 %v1836_v45 }
 0x984   : > { %v1832_v5 = vpop.xlane.xlu1 %1831 }
 0x985   : > { %v1840_v46 = vmul.f32 0.03125, %v1832_v5 }
 0x986   : > { %v1835_v6 = vpop.xlane.xlu0 %1834 }
 0x987   : > { %v1843_v47 = vsub.f32 %v2628_v56, %v1840_v46  ;;  %v1841_v7 = vmul.f32 0.03125, %v1835_v6 }
 0x989   : > { %v1844_v48 = vsub.f32 %v2629_v40, %v1841_v7  ;;  %v1846_v49 = vmul.f32 %v1843_v47, %v1843_v47 }
 0x98a   : > { %v1838_v50 = vpop.xlane.xlu0 %1837 }
 0x98b   : > { %v1842_v51 = vmul.f32 0.03125, %v1838_v50  ;;  %v1849_v53 = vsel %vm796_vm1, %v1846_v49, 0.0  ;;  %v1847_v54 = vmul.f32 %v1844_v48, %v1844_v48 }
 0x98c   : > { %1850 = vadd.xlane.f32.xlu1 %v1849_v53 }
 0x98d   : > { %v1845_v55 = vsub.f32 %v2627_v42, %v1842_v51  ;;  %v1852_v57 = vsel %vm796_vm1, %v1847_v54, 0.0 }
 0x98e   : > { %1853 = vadd.xlane.f32.xlu0 %v1852_v57 }
 0x98f   : > { %v1848_v58 = vmul.f32 %v1845_v55, %v1845_v55 }
 0x991   : > { %v1855_v59 = vsel %vm796_vm1, %v1848_v58, 0.0 }
 0x992   : > { %1856 = vadd.xlane.f32.xlu1 %v1855_v59 }
 0xa19   : > { %v1851_v63 = vpop.xlane.xlu1 %1850 }
 0xa1a   : > { %v1858_v0 = vmul.f32 0.03125, %v1851_v63 }
 0xa1b   : > { %v1854_v1 = vpop.xlane.xlu0 %1853 }
 0xa1c   : > { %v1861_v2 = vadd.f32 1e-12, %v1858_v0  ;;  %v1859_v3 = vmul.f32 0.03125, %v1854_v1  ;;  %v2435_v1 = vld [vmem:[%s743_s16] ss:$0 sm:$0xff] }
 0xa1e   : > { %2822 = vrsqrt.f32 %v1861_v2  ;;  %v1862_v4 = vadd.f32 1e-12, %v1859_v3 }
 0xa1f   : > { %v1857_v8 = vpop.xlane.xlu1 %1856 }
 0xa20   : > { %2824 = vrsqrt.f32 %v1862_v4  ;;  %v1860_v9 = vmul.f32 0.03125, %v1857_v8 }
 0xa22   : > { %v1863_v10 = vadd.f32 1e-12, %v1860_v9 }
 0xa24   : > { %2826 = vrsqrt.f32 %v1863_v10 }
 0xa28   : > { %v2823_v11 = vpop.eup %2822 }
 0xa29   : > { %v1867_v13 = vmul.f32 %v2823_v11, %v1843_v47 }
 0xa2a   : > { %v2825_v14 = vpop.eup %2824 }
 0xa2b   : > { %v1868_v15 = vmul.f32 %v2825_v14, %v1844_v48  ;;  %v1876_v16 = vmul.f32 %v2428_v12, %v1867_v13 }
 0xa2d   : > { %v1877_v18 = vmul.f32 %v2428_v12, %v1868_v15  ;;  %v3569_v19 = vadd.f32 %v2429_v17, %v1876_v16 }
 0xa2e   : > { %v2827_v20 = vpop.eup %2826 }
 0xa2f   : > { %v1869_v21 = vmul.f32 %v2827_v20, %v1845_v55  ;;  %v3571_v22 = vadd.f32 %v2429_v17, %v1877_v18 }
 0xa31   : > { %v1888_v23 = vpack.c.bf16 %v3571_v22, %v3569_v19  ;;  %v1878_v24 = vmul.f32 %v2428_v12, %v1869_v21 }
 0xa33   : > { %2611 = vmatprep.mubr.msk.bf16.mxu1 %vm796_vm1, %v1888_v23  ;;  %v3576_v25 = vadd.f32 %v2429_v17, %v1878_v24 }
 0xa35   : > { %v1889_v26 = vpack.c.bf16 %v3576_v25, %v3576_v25 }
 0xa37   : > { %2612 = vmatmul.mubr.msk.bf16.vlgmr.msra.gmra.mrb[20].mxu1 %vm796_vm1, %v1889_v26 }
 0xb0a   : > { %v2613_v30 = vpop.f32.mrb[20].mxu1 }
 0xb0b   : > { %v1962_v31 = vadd.f32 %v2613_v30, %v2430_v29  ;;  %v1953_v32 = vpop.f32.mrb[21].mxu1 }
 0xb0c   : > { %v1954_v33 = vadd.f32 %v2430_v29, %v1953_v32  ;;  %v2614_v34 = vpop.f32.mrb[22].mxu1 }
 0xb0d   : > { %v1972_v35 = vmul.f32 0.044715, %v1962_v31  ;;  %v1956_v37 = vpop.f32.mrb[23].mxu1  ;;  %v1969_v54 = vmul.f32 0.5, %v1962_v31 }
 0xb0e   : > { %v1970_v52 = vmul.f32 0.044715, %v1954_v33  ;;  %v1957_v38 = vadd.f32 %v2430_v29, %v1956_v37  ;;  %v1967_v55 = vmul.f32 0.5, %v1954_v33 }
 0xb0f   : > { %v1975_v56 = vmul.f32 %v1972_v35, %v1962_v31 }
 0xb10   : > { %v1973_v39 = vmul.f32 %v1970_v52, %v1954_v33  ;;  %v1971_v60 = vmul.f32 0.044715, %v1957_v38  ;;  %v1968_v57 = vmul.f32 0.5, %v1957_v38 }
 0xb11   : > { %v1978_v40 = vmul.f32 %v1975_v56, %v1962_v31 }
 0xb12   : > { %v1976_v41 = vmul.f32 %v1973_v39, %v1954_v33  ;;  %v1974_v42 = vmul.f32 %v1971_v60, %v1957_v38  ;;  %v2442_v60 = vld [vmem:[%s746_s10] ss:$0 sm:$0xff] }
 0xb13   : > { %v1981_v43 = vadd.f32 %v1978_v40, %v1962_v31 }
 0xb14   : > { %v1979_v45 = vadd.f32 %v1976_v41, %v1954_v33  ;;  %v1977_v5 = vmul.f32 %v1974_v42, %v1957_v38  ;;  %v2443_v42 = vld [vmem:[%s749_s5] ss:$0 sm:$0xff] }
 0xb15   : > { %v1984_v46 = vmul.f32 0.7978846, %v1981_v43 }
 0xb16   : > { %v1982_v6 = vmul.f32 0.7978846, %v1979_v45  ;;  %v1980_v47 = vadd.f32 %v1977_v5, %v1957_v38 }
 0xb17   : > { %2828 = vtanh.f32 %v1984_v46 }
 0xb18   : > { %2830 = vtanh.f32 %v1982_v6  ;;  %v1983_v7 = vmul.f32 0.7978846, %v1980_v47 }
 0xb1a   : > { %2832 = vtanh.f32 %v1983_v7 }
 0xb21   : > { %v2829_v48 = vpop.eup %2828 }
 0xb22   : > { %v2831_v49 = vpop.eup %2830  ;;  %v1990_v50 = vadd.f32 1.0, %v2829_v48 }
 0xb23   : > { %v1988_v51 = vadd.f32 1.0, %v2831_v49 }
 0xb24   : > { %v2833_v53 = vpop.eup %2832  ;;  %v1993_v59 = vmul.f32 %v1990_v50, %v1969_v54 }
 0xb25   : > { %v1989_v58 = vadd.f32 1.0, %v2833_v53  ;;  %v1991_v61 = vmul.f32 %v1988_v51, %v1967_v55 }
 0xb26   : > { %v1995_v0 = vpack.c.bf16 %v1993_v59, %v1993_v59 }
 0xb27   : > { %v1992_v62 = vmul.f32 %v1989_v58, %v1968_v57 }
 0xb29   : > { %v1994_v63 = vpack.c.bf16 %v1992_v62, %v1991_v61 }
 0xb2b   : > { %2623 = vmatprep.mubr.msk.bf16.mxu0 %vm2035_vm5, %v1994_v63 }
 0xb2c   : > { %2624 = vmatmul.mubr.msk.bf16.vlgmr.msra.gmra.mrb[20].mxu0 %vm2035_vm5, %v1995_v0 }
 0xbff   : > { %v2625_v2 = vpop.f32.mrb[20].mxu0 }
 0xc00   : > { %v2076_v3 = vpop.f32.mrb[21].mxu0  ;;  %v2085_v4 = vadd.f32 %v2625_v2, %v2435_v1 }
 0xc01   : > { %v2077_v8 = vadd.f32 %v2435_v1, %v2076_v3  ;;  %v2626_v9 = vpop.f32.mrb[22].mxu0 }
 0xc02   : > { %v2079_v10 = vpop.f32.mrb[23].mxu0  ;;  %v2092_v15 = vadd.f32 %v2085_v4, %v3576_v25 }
 0xc03   : > { %v2080_v11 = vadd.f32 %v2435_v1, %v2079_v10  ;;  %v2090_v12 = vadd.f32 %v2077_v8, %v3569_v19 }
 0xc04   : > { %v2101_v17 = vsel %vm796_vm1, %v2092_v15, 0.0 }
 0xc05   : > { %v2095_v13 = vsel %vm796_vm1, %v2090_v12, 0.0  ;;  %v2091_v14 = vadd.f32 %v2080_v11, %v3571_v22 }
 0xc06   : > { %2096 = vadd.xlane.f32.xlu0 %v2095_v13 }
 0xc07   : > { %v2098_v16 = vsel %vm796_vm1, %v2091_v14, 0.0 }
 0xc08   : > { %2099 = vadd.xlane.f32.xlu1 %v2098_v16 }
 0xc0a   : > { %2102 = vadd.xlane.f32.xlu0 %v2101_v17 }
 0xc93   : > { %v2097_v18 = vpop.xlane.xlu0 %2096 }
 0xc94   : > { %v2104_v20 = vmul.f32 0.03125, %v2097_v18 }
 0xc95   : > { %v2100_v21 = vpop.xlane.xlu1 %2099 }
 0xc96   : > { %v2107_v23 = vsub.f32 %v2090_v12, %v2104_v20  ;;  %v2105_v24 = vmul.f32 0.03125, %v2100_v21 }
 0xc97   : > { %v2103_v26 = vpop.xlane.xlu0 %2102 }
 0xc98   : > { %v2108_v19 = vsub.f32 %v2091_v14, %v2105_v24  ;;  %v2106_v27 = vmul.f32 0.03125, %v2103_v26  ;;  %v2110_v44 = vmul.f32 %v2107_v23, %v2107_v23 }
 0xc9a   : > { %v2109_v36 = vsub.f32 %v2092_v15, %v2106_v27  ;;  %v2113_v22 = vsel %vm796_vm1, %v2110_v44, 0.0  ;;  %v2111_v25 = vmul.f32 %v2108_v19, %v2108_v19 }
 0xc9b   : > { %2114 = vadd.xlane.f32.xlu1 %v2113_v22 }
 0xc9c   : > { %v2116_v28 = vsel %vm796_vm1, %v2111_v25, 0.0  ;;  %v2112_v29 = vmul.f32 %v2109_v36, %v2109_v36 }
 0xc9d   : > { %2117 = vadd.xlane.f32.xlu0 %v2116_v28 }
 0xc9e   : > { %v2119_v30 = vsel %vm796_vm1, %v2112_v29, 0.0 }
 0xc9f   : > { %2120 = vadd.xlane.f32.xlu1 %v2119_v30 }
 0xd28   : > { %v2115_v31 = vpop.xlane.xlu1 %2114 }
 0xd29   : > { %v2122_v32 = vmul.f32 0.03125, %v2115_v31 }
 0xd2a   : > { %v2118_v33 = vpop.xlane.xlu0 %2117 }
 0xd2b   : > { %v2125_v34 = vadd.f32 1e-12, %v2122_v32  ;;  %v2123_v35 = vmul.f32 0.03125, %v2118_v33 }
 0xd2c   : > { %v2121_v37 = vpop.xlane.xlu1 %2120 }
 0xd2d   : > { %2834 = vrsqrt.f32 %v2125_v34  ;;  %v2126_v52 = vadd.f32 1e-12, %v2123_v35  ;;  %v2124_v38 = vmul.f32 0.03125, %v2121_v37 }
 0xd2f   : > { %2836 = vrsqrt.f32 %v2126_v52  ;;  %v2127_v56 = vadd.f32 1e-12, %v2124_v38 }
 0xd31   : > { %2838 = vrsqrt.f32 %v2127_v56 }
 0xd37   : > { %v2835_v39 = vpop.eup %2834 }
 0xd38   : > { %v2131_v40 = vmul.f32 %v2835_v39, %v2107_v23 }
 0xd39   : > { %v2837_v41 = vpop.eup %2836 }
 0xd3a   : > { %v2140_v43 = vmul.f32 %v2442_v60, %v2131_v40  ;;  %v2132_v45 = vmul.f32 %v2837_v41, %v2108_v19 }
 0xd3b   : > { %v2839_v5 = vpop.eup %2838 }
 0xd3c   : > { %v2149_v46 = vadd.f32 %v2443_v42, %v2140_v43  ;;  %v2141_v6 = vmul.f32 %v2442_v60, %v2132_v45  ;;  %v2133_v47 = vmul.f32 %v2839_v5, %v2109_v36  ;;  %2158 = sbr.rel (%p2444_p1) target bundleno = 3395 (0xd43), region = 104 }
 0xd3e   : > { %2152 = vst.msk [vmem:[#allocation2] sm:$0xff] %vm796_vm1, %v2149_v46  ;;  %v2150_v7 = vadd.f32 %v2443_v42, %v2141_v6  ;;  %v2142_v48 = vmul.f32 %v2442_v60, %v2133_v47  ;;  %2159 = vst.msk [vmem:[#allocation11] sm:$0xff] (!%p2444_p1), %vm796_vm1, %v2149_v46 }
 0xd40   : > { %2153 = vst.msk [vmem:[#allocation2 + $0x8] sm:$0xff] %vm796_vm1, %v2150_v7  ;;  %v2151_v49 = vadd.f32 %v2443_v42, %v2142_v48  ;;  %2160 = vst.msk [vmem:[#allocation11 + $0x8] sm:$0xff] (!%p2444_p1), %vm796_vm1, %v2150_v7 }
 0xd42   : > { %2154 = vst.msk [vmem:[#allocation2 + $0x10] sm:$0xff] %vm796_vm1, %v2151_v49  ;;  %2161 = vst.msk [vmem:[#allocation11 + $0x10] sm:$0xff] (!%p2444_p1), %vm796_vm1, %v2151_v49 }
 0xd43 PF: > { %s3738_s27 = sadd.s32 4294967295, %s3042_s23   ;;  %s3062_s5 = smov [#allocation11]  }
 0xd44   : > { %p3619_p4 = scmp.eq.s32.totalorder %s3738_s27, 1  ;;  %s2171_s0 = sshll.u32 %s3062_s5, 4  ;;  %s2172_s0 = int_to_ptr.vmem [resolvable:$true] %s2171_s0 }
 0xd45   : > { %s2954_s1 = scalar_lea.vmem %s2172_s0, 384  ;;  %p2961_p11 = scmp.lt.s32.totalorder %s2172_s0, %s2172_s0 }
 0xd46   : > { %p2955_p5 = scmp.ne.s32.totalorder %s2172_s0, %s2954_s1  ;;  %p2962_p13 = scmp.lt.s32.totalorder %s2954_s1, %s2954_s1 }
 0xd48   : > { %p2956_p8 = pnand %p2955_p5, %p3619_p4  ;;  %p2963_p2 = por %p2962_p13, %p2961_p11 }
 0xd4a   : > { %p2957_p10 = pneg %p2956_p8 }
 0xd4c   : > { %p2964_p3 = pnand %p2963_p2, %p2957_p10 }
 0xd4e   : > { %2967 = shalt.err (!%p2964_p3)
}
 0xd4f   : > { %s3740_s14 = sld [smem:[#allocation33_spill]] }
 0xd55   : > { %s2968_s15 = scalar_lea.hbm %s3740_s14, 384 }
 0xd56   : > { %p2969_p0 = scmp.ne.s32.totalorder %s3740_s14, %s2968_s15  ;;  %p2974_p6 = scmp.lt.u32.totalorder %s2968_s15, %s3740_s14 }
 0xd58   : > { %p2970_p12 = pnand %p2969_p0, %p3619_p4 }
 0xd5a   : > { %p2971_p7 = pneg %p2970_p12 }
 0xd5c   : > { %p2976_p9 = pnand %p2974_p6, %p2971_p7 }
 0xd5e   : > { %2979 = shalt.err (!%p2976_p9)
}
 0xd5f   : > { %s3063_s17 = smov 128  }
 0xd60   : > { %2673 = dma.vmem_to_hbm [thread:$0]  (%p3619_p4), %s2172_s0, 384, %s3740_s14, [#allocation5], %s3063_s17, %s3063_s17, %s3061_s12  }
 0xd61   : > { %3017 = dma.done.wait (%p3619_p4), [#allocation5], 384  }
 0xd62   : > { %3019 = vsyncadd (%p3619_p4), [#allocation5], 4294966912 }
 0xd63 PF: > { %s31_s23 = sadd.s32 1, %s3042_s23   ;;  %s3741_s29 = sld [smem:[#allocation18_spill]] }
 0xd64   : > { %p28_p1 = scmp.ge.s32.totalorder %s31_s23, 4   ;;  %s3742_s21 = sld [smem:[#allocation16_spill]] }
 0xd65   : > { %s3743_s22 = sld [smem:[#allocation17_spill]]  ;;  %s3744_s18 = smov %s3026_s19 }
 0xd66   : > { %s3745_s19 = smov %s3030_s20  ;;  %30 = sbr.rel (!%p28_p1) target bundleno = 23 (0x17), region = 174 }
 0xd69   : > { %s3746_s20 = smov %s3741_s29 }
 0xd6d   :  { %2187 = vsyncpa [#allocation4], 1 }
 0xd6e   :  { %2189 = vsyncpa [#allocation4 + $0x1], 1 }
 0xd6f   :  { %2190 = vsyncpa [#allocation7], 1 }
 0xd70   :  { %2191 = vsyncpa [#allocation10], 1 }
 0xd71   :  { %2193 = vsyncpa [#allocation10 + $0x1], 1 }
 0xd72   :  { %2194 = vsyncpa [#allocation5], 1 }
 0xd73   :  { %2196 = vsyncpa [#allocation5 + $0x1], 1 }

</bundles_post_ra>
